<compile_context>
chip_gen: v5e
topology: v5e:2x2
jax: 0.10.0
libtpu: 0.0.40
codegen_flags: <defaults>
</compile_context>

<pallas_src>
import math
import jax
import jax.numpy as jnp
from jax.experimental import pallas as pl
from jax.experimental.pallas import tpu as pltpu


def _dbof_kernel(x_ref, wc_ref, cshift_ref,
                 wh_ref, hshift_ref,
                 wo_ref, bo_ref,
                 out_ref, maxacc_ref):
    """Grid = (batch tiles, frame tiles). Frame axis is the inner reduction axis."""
    fi = pl.program_id(1)
    TB, FT, D = x_ref.shape
    C = wc_ref.shape[1]

    # (TB, FT, D) -> (TB*FT, D): FT is a multiple of 16 (bf16 sublane pack), so this is
    # a free relayout; turns the cluster projection into one MXU-filling GEMM per step.
    x = x_ref[...].reshape(TB * FT, D)                                    # bf16

    # cluster projection (input_bn + cluster_bn scale already folded into wc) + shift + ReLU6
    act = jnp.dot(x, wc_ref[...], preferred_element_type=jnp.float32)    # (TB*FT, C) f32
    act = jnp.clip(act + cshift_ref[...], 0.0, 6.0)

    # FramePooling('max'): reduce this frame tile, then lane-wise max into the accumulator.
    tile_max = jnp.max(act.reshape(TB, FT, C), axis=1)                    # (TB, C) f32

    @pl.when(fi == 0)
    def _():
        maxacc_ref[...] = tile_max

    @pl.when(fi > 0)
    def _():
        maxacc_ref[...] = jnp.maximum(maxacc_ref[...], tile_max)          # pure VPU

    @pl.when(fi == pl.num_programs(1) - 1)
    def _():
        pooled = maxacc_ref[...]                                          # (TB, C) f32
        # hidden projection (hidden1_bn scale folded into wh) + shift + ReLU6
        h = jnp.dot(pooled.astype(wh_ref.dtype), wh_ref[...],
                    preferred_element_type=jnp.float32)                   # (TB, H) f32
        h = jnp.clip(h + hshift_ref[...], 0.0, 6.0)
        # final Linear classifier: logits = h @ W_out^T + b (W_out passed pre-transposed,
        # lane-padded to a 128 multiple)
        logits = jnp.dot(h.astype(wo_ref.dtype), wo_ref[...],
                         preferred_element_type=jnp.float32) + bo_ref[...]
        out_ref[...] = logits                                             # dense (TB, Vp) store


def _vmem_limit_bytes(frac=0.8, fallback=64 * 1024 * 1024):
    """~80% of physical VMEM (leave headroom for compiler scratch / semaphores):
    ~51 MiB on v7x (64 MiB/TC), ~102 MiB on v5e/v6e (128 MiB)."""
    try:
        cap = getattr(pltpu.get_tpu_info(), "vmem_capacity_bytes", fallback)
    except Exception:
        cap = fallback
    return int(cap * frac)


def dbof_forward(x, kp, *, tb=16, ft=16):
    """x: (B, F, D) float32. kp: kernel params (BN-folded, matmul weights in bf16).

    At production sizes raise tb toward 128-256 (MXU M-fill for the hidden/classifier
    GEMMs) while keeping the batch grid >= 2 steps so both v7x TensorCores get work.
    """
    B, F, D = x.shape
    C = kp["w_cluster"].shape[1]
    H = kp["w_hidden"].shape[1]
    Vp = kp["w_out_t"].shape[1]
    V = kp["vocab_size"]

    # Frame tiling: ft must divide F and be a multiple of 16 (bf16 sublane pack) so the
    # in-kernel (tb, ft, D) -> (tb*ft, D) reshape is a free relayout.
    # TODO(synk): real DBoF uses F=300 -> pad frames to a multiple of 16 and mask the pad
    # rows (e.g. to -inf) before the frame-max inside the kernel.
    assert F % ft == 0 and ft % 16 == 0, (F, ft)

    # Prefer a tb that divides B (avoids an extra whole-array HBM pad copy of x).
    tb = max(8, min(tb, B))
    while B % tb != 0 and tb > 8:
        tb -= 8
    Bp = pl.cdiv(B, tb) * tb
    xb = x.astype(jnp.bfloat16)
    if Bp != B:
        xb = jnp.pad(xb, ((0, Bp - B), (0, 0), (0, 0)))

    # Grid-invariant operands: constant index_map + single buffering (double-buffering a
    # weight that never changes only doubles its VMEM footprint).
    const = lambda shape: pl.BlockSpec(shape, lambda b, f: (0, 0),
                                       pipeline_mode=pl.Buffered(1))
    # TODO(synk): at realistic sizes (C~8192, V~3862) also add grid axes over C / V (or
    # fp8-quantize w_cluster on v7x) if the resident weights approach the VMEM limit.

    out = pl.pallas_call(
        _dbof_kernel,
        out_shape=jax.ShapeDtypeStruct((Bp, Vp), jnp.float32),
        grid_spec=pltpu.PrefetchScalarGridSpec(
            num_scalar_prefetch=0,
            grid=(Bp // tb, F // ft),
            in_specs=[
                pl.BlockSpec((tb, ft, D), lambda b, f: (b, f, 0)),  # x tile (bf16)
                const((D, C)),                                      # folded cluster weights (bf16)
                const((1, C)),                                      # cluster shift (f32)
                const((C, H)),                                      # folded hidden weights (bf16)
                const((1, H)),                                      # hidden shift (f32)
                const((H, Vp)),                                     # classifier W^T (bf16, lane-padded)
                const((1, Vp)),                                     # classifier bias (f32, lane-padded)
            ],
            out_specs=pl.BlockSpec((tb, Vp), lambda b, f: (b, 0)),
            scratch_shapes=[pltpu.VMEM((tb, C), jnp.float32)],      # running frame-max
        ),
        compiler_params=pltpu.CompilerParams(
            dimension_semantics=("parallel", "arbitrary"),
            vmem_limit_bytes=_vmem_limit_bytes()),
    )(xb,
      kp["w_cluster"], kp["c_shift"],
      kp["w_hidden"], kp["h_shift"],
      kp["w_out_t"], kp["b_out"])
    return out[:B, :V]


def _fold_bn(gamma, beta, mean, var, eps=1e-5):
    scale = gamma / jnp.sqrt(var + eps)
    shift = beta - mean * scale
    return scale, shift


def make_raw_params(key, D, C, H, V):
    """Deterministic synthetic parameters matching the module's shapes (f32, unfolded)."""
    ks = jax.random.split(key, 8)
    f32 = jnp.float32

    def bn(k, n):
        k1, k2, k3, k4 = jax.random.split(k, 4)
        gamma = 1.0 + 0.1 * jax.random.normal(k1, (n,), f32)
        beta = 0.1 * jax.random.normal(k2, (n,), f32)
        mean = 0.05 * jax.random.normal(k3, (n,), f32)
        var = 1.0 + 0.1 * jnp.abs(jax.random.normal(k4, (n,), f32))
        return _fold_bn(gamma, beta, mean, var)

    in_scale, in_shift = bn(ks[0], D)
    c_scale, c_shift = bn(ks[1], C)
    h_scale, h_shift = bn(ks[2], H)

    w_cluster = (1.0 / math.sqrt(D)) * jax.random.normal(ks[3], (D, C), f32)
    w_hidden = (1.0 / math.sqrt(C)) * jax.random.normal(ks[4], (C, H), f32)
    # nn.Linear(H, V): weight (V, H), bias (V,)
    bound = 1.0 / math.sqrt(H)
    w_out = jax.random.uniform(ks[5], (V, H), f32, minval=-bound, maxval=bound)
    b_out = jax.random.uniform(ks[6], (V,), f32, minval=-bound, maxval=bound)

    return dict(in_scale=in_scale, in_shift=in_shift,
                w_cluster=w_cluster, c_scale=c_scale, c_shift=c_shift,
                w_hidden=w_hidden, h_scale=h_scale, h_shift=h_shift,
                w_out=w_out, b_out=b_out)


def make_kernel_params(rp):
    """Fold BN affine transforms into the matmul weights (done in f32, then cast to bf16):
       input_bn + cluster_bn scale -> w_cluster ;  hidden1_bn scale -> w_hidden.
    Shifts and the classifier bias stay f32. Classifier padded to a 128-lane multiple."""
    bf16 = jnp.bfloat16
    wc = rp["w_cluster"] * rp["in_scale"][:, None] * rp["c_scale"][None, :]   # (D, C)
    c_shift = rp["c_shift"] + (rp["in_shift"] @ rp["w_cluster"]) * rp["c_scale"]
    wh = rp["w_hidden"] * rp["h_scale"][None, :]                              # (C, H)
    h_shift = rp["h_shift"]

    w_out_t = rp["w_out"].T                                                   # (H, V)
    b_out = rp["b_out"]
    V = b_out.shape[0]
    Vp = pl.cdiv(V, 128) * 128
    if Vp != V:
        w_out_t = jnp.pad(w_out_t, ((0, 0), (0, Vp - V)))
        b_out = jnp.pad(b_out, ((0, Vp - V),))

    return dict(
        w_cluster=wc.astype(bf16),
        c_shift=c_shift[None, :].astype(jnp.float32),
        w_hidden=wh.astype(bf16),
        h_shift=h_shift[None, :].astype(jnp.float32),
        w_out_t=w_out_t.astype(bf16),
        b_out=b_out[None, :].astype(jnp.float32),
        vocab_size=V,
    )


def dbof_reference(x, rp):
    """Pure-JAX f32 reference of the PyTorch forward (BN eval mode, unfolded)."""
    x = x * rp["in_scale"] + rp["in_shift"]                     # input_bn
    act = jnp.einsum("bfd,dc->bfc", x, rp["w_cluster"])         # cluster matmul
    act = act * rp["c_scale"] + rp["c_shift"]                   # cluster_bn
    act = jnp.clip(act, 0.0, 6.0)                               # ReLU6
    act = act.reshape(act.shape[0], 1, -1, act.shape[-1])       # (B,1,F,C)
    pooled = jnp.max(act, axis=2)                               # FramePooling max -> (B,1,C)
    h = jnp.einsum("bkc,ch->bkh", pooled, rp["w_hidden"])       # hidden matmul
    h = h * rp["h_scale"] + rp["h_shift"]                       # hidden1_bn
    h = jnp.clip(h, 0.0, 6.0)                                   # ReLU6
    h = h[:, 0, :]                                              # squeeze(1)
    return h @ rp["w_out"].T + rp["b_out"]                      # Linear


if __name__ == "__main__":
    # Small shapes consistent with the module (feature = video + audio), sized so the
    # kernel exercises a 2x2 grid: 2 batch tiles (parallel) x 2 frame tiles (streamed max).
    B, F = 32, 32
    VIDEO, AUDIO = 112, 16
    D = VIDEO + AUDIO        # feature_size = 128
    C = 256                  # cluster_size (small synthetic)
    H = 128                  # hidden1_size
    V = 256                  # vocab_size

    key = jax.random.PRNGKey(0)
    kx, kp = jax.random.split(key)
    x = jax.random.normal(kx, (B, F, D), jnp.float32)
    raw = make_raw_params(kp, D, C, H, V)
    kernel_params = make_kernel_params(raw)

    out = dbof_forward(x, kernel_params, tb=16, ft=16)
    out = jax.block_until_ready(out)

    ref = dbof_reference(x, raw)
    assert out.shape == (B, V), out.shape
    assert bool(jnp.all(jnp.isfinite(out)))
    # bf16 matmul operands (with BN scales folded in), f32 accumulation -> loose-ish tolerance.
    assert bool(jnp.allclose(out, ref, rtol=5e-2, atol=5e-2)), \
        float(jnp.max(jnp.abs(out - ref)))

    print("KERNEL_OK")
</pallas_src>

<mosaic_0001>
module attributes {stable_mosaic.version = 11 : i64} {
  func.func @_dbof_kernel(%arg0: i32, %arg1: i32, %arg2: memref<16x16x128xbf16, #tpu.memory_space<vmem>>, %arg3: memref<128x256xbf16, #tpu.memory_space<vmem>>, %arg4: memref<1x256xf32, #tpu.memory_space<vmem>>, %arg5: memref<256x128xbf16, #tpu.memory_space<vmem>>, %arg6: memref<1x128xf32, #tpu.memory_space<vmem>>, %arg7: memref<128x256xbf16, #tpu.memory_space<vmem>>, %arg8: memref<1x256xf32, #tpu.memory_space<vmem>>, %arg9: memref<16x256xf32, #tpu.memory_space<vmem>>, %arg10: memref<16x256xf32, #tpu.memory_space<vmem>>) attributes {dimension_semantics = [#tpu.dimension_semantics<parallel>, #tpu.dimension_semantics<arbitrary>], iteration_bounds = array<i64: 2, 2>, scalar_prefetch = 0 : i64, scratch_operands = 1 : i64, tpu.core_type = #tpu.core_type<tc>, window_params = [{transform_indices = @transform_0, window_bounds = array<i64: 16, 16, 128>}, {pipeline_mode = #tpu.pipeline_mode<synchronous>, transform_indices = @transform_1, window_bounds = array<i64: 128, 256>}, {pipeline_mode = #tpu.pipeline_mode<synchronous>, transform_indices = @transform_2, window_bounds = array<i64: 1, 256>}, {pipeline_mode = #tpu.pipeline_mode<synchronous>, transform_indices = @transform_3, window_bounds = array<i64: 256, 128>}, {pipeline_mode = #tpu.pipeline_mode<synchronous>, transform_indices = @transform_4, window_bounds = array<i64: 1, 128>}, {pipeline_mode = #tpu.pipeline_mode<synchronous>, transform_indices = @transform_5, window_bounds = array<i64: 128, 256>}, {pipeline_mode = #tpu.pipeline_mode<synchronous>, transform_indices = @transform_6, window_bounds = array<i64: 1, 256>}, {transform_indices = @transform_7, window_bounds = array<i64: 16, 256>}]} {
    %c0 = arith.constant 0 : index
    %c0_0 = arith.constant 0 : index
    %c0_1 = arith.constant 0 : index
    %0 = vector.load %arg2[%c0, %c0_0, %c0_1] : memref<16x16x128xbf16, #tpu.memory_space<vmem>>, vector<16x16x128xbf16>
    %1 = vector.shape_cast %0 : vector<16x16x128xbf16> to vector<256x128xbf16>
    %c0_2 = arith.constant 0 : index
    %c0_3 = arith.constant 0 : index
    %2 = vector.load %arg3[%c0_2, %c0_3] : memref<128x256xbf16, #tpu.memory_space<vmem>>, vector<128x256xbf16>
    %cst = arith.constant dense<0.000000e+00> : vector<256x256xf32>
    %3 = tpu.matmul %1, %2, %cst {dimension_numbers = #tpu.dot_dimension_numbers<[1], [0], [0], [1], [0, 0, 1, 1], [], []>} : vector<256x128xbf16>, vector<128x256xbf16>, vector<256x256xf32> -> vector<256x256xf32>
    %c0_4 = arith.constant 0 : index
    %c0_5 = arith.constant 0 : index
    %4 = vector.load %arg4[%c0_4, %c0_5] : memref<1x256xf32, #tpu.memory_space<vmem>>, vector<1x256xf32>
    %5 = vector.broadcast %4 : vector<1x256xf32> to vector<256x256xf32>
    %6 = arith.addf %3, %5 : vector<256x256xf32>
    %cst_6 = arith.constant 0.000000e+00 : f32
    %cst_7 = arith.constant 6.000000e+00 : f32
    %7 = vector.broadcast %cst_6 : f32 to vector<256x256xf32>
    %8 = arith.maximumf %7, %6 : vector<256x256xf32>
    %9 = vector.broadcast %cst_7 : f32 to vector<256x256xf32>
    %10 = arith.minimumf %9, %8 : vector<256x256xf32>
    %11 = vector.shape_cast %10 : vector<256x256xf32> to vector<16x16x256xf32>
    %cst_8 = arith.constant dense<0xFF800000> : vector<16x256xf32>
    %12 = vector.multi_reduction <maximumf>, %11, %cst_8 [1] : vector<16x16x256xf32> to vector<16x256xf32>
    %c0_i32 = arith.constant 0 : i32
    %13 = arith.cmpi eq, %arg1, %c0_i32 : i32
    %14 = arith.extui %13 : i1 to i32
    %c0_i32_9 = arith.constant 0 : i32
    %15 = arith.cmpi ne, %14, %c0_i32_9 : i32
    scf.if %15 {
      %c0_13 = arith.constant 0 : index
      %c0_14 = arith.constant 0 : index
      %22 = vector.load %arg10[%c0_13, %c0_14] : memref<16x256xf32, #tpu.memory_space<vmem>>, vector<16x256xf32>
      tpu.vector_store %arg10[%c0_13, %c0_14], %12 {strides = array<i32>} : memref<16x256xf32, #tpu.memory_space<vmem>>, vector<16x256xf32>,
    } else {
    }
    %c0_i32_10 = arith.constant 0 : i32
    %16 = arith.cmpi sgt, %arg1, %c0_i32_10 : i32
    %17 = arith.extui %16 : i1 to i32
    %c0_i32_11 = arith.constant 0 : i32
    %18 = arith.cmpi ne, %17, %c0_i32_11 : i32
    scf.if %18 {
      %c0_13 = arith.constant 0 : index
      %c0_14 = arith.constant 0 : index
      %22 = vector.load %arg10[%c0_13, %c0_14] : memref<16x256xf32, #tpu.memory_space<vmem>>, vector<16x256xf32>
      %23 = arith.maximumf %22, %12 : vector<16x256xf32>
      %c0_15 = arith.constant 0 : index
      %c0_16 = arith.constant 0 : index
      %24 = vector.load %arg10[%c0_15, %c0_16] : memref<16x256xf32, #tpu.memory_space<vmem>>, vector<16x256xf32>
      tpu.vector_store %arg10[%c0_15, %c0_16], %23 {strides = array<i32>} : memref<16x256xf32, #tpu.memory_space<vmem>>, vector<16x256xf32>,
    } else {
    }
    %c1_i32 = arith.constant 1 : i32
    %19 = arith.cmpi eq, %arg1, %c1_i32 : i32
    %20 = arith.extui %19 : i1 to i32
    %c0_i32_12 = arith.constant 0 : i32
    %21 = arith.cmpi ne, %20, %c0_i32_12 : i32
    scf.if %21 {
      %c0_13 = arith.constant 0 : index
      %c0_14 = arith.constant 0 : index
      %22 = vector.load %arg10[%c0_13, %c0_14] : memref<16x256xf32, #tpu.memory_space<vmem>>, vector<16x256xf32>
      %23 = arith.truncf %22 : vector<16x256xf32> to vector<16x256xbf16>
      %c0_15 = arith.constant 0 : index
      %c0_16 = arith.constant 0 : index
      %24 = vector.load %arg5[%c0_15, %c0_16] : memref<256x128xbf16, #tpu.memory_space<vmem>>, vector<256x128xbf16>
      %cst_17 = arith.constant dense<0.000000e+00> : vector<16x128xf32>
      %25 = tpu.matmul %23, %24, %cst_17 {dimension_numbers = #tpu.dot_dimension_numbers<[1], [0], [0], [1], [0, 0, 1, 1], [], []>} : vector<16x256xbf16>, vector<256x128xbf16>, vector<16x128xf32> -> vector<16x128xf32>
      %c0_18 = arith.constant 0 : index
      %c0_19 = arith.constant 0 : index
      %26 = vector.load %arg6[%c0_18, %c0_19] : memref<1x128xf32, #tpu.memory_space<vmem>>, vector<1x128xf32>
      %27 = vector.broadcast %26 : vector<1x128xf32> to vector<16x128xf32>
      %28 = arith.addf %25, %27 : vector<16x128xf32>
      %cst_20 = arith.constant 0.000000e+00 : f32
      %cst_21 = arith.constant 6.000000e+00 : f32
      %29 = vector.broadcast %cst_20 : f32 to vector<16x128xf32>
      %30 = arith.maximumf %29, %28 : vector<16x128xf32>
      %31 = vector.broadcast %cst_21 : f32 to vector<16x128xf32>
      %32 = arith.minimumf %31, %30 : vector<16x128xf32>
      %33 = arith.truncf %32 : vector<16x128xf32> to vector<16x128xbf16>
      %c0_22 = arith.constant 0 : index
      %c0_23 = arith.constant 0 : index
      %34 = vector.load %arg7[%c0_22, %c0_23] : memref<128x256xbf16, #tpu.memory_space<vmem>>, vector<128x256xbf16>
      %cst_24 = arith.constant dense<0.000000e+00> : vector<16x256xf32>
      %35 = tpu.matmul %33, %34, %cst_24 {dimension_numbers = #tpu.dot_dimension_numbers<[1], [0], [0], [1], [0, 0, 1, 1], [], []>} : vector<16x128xbf16>, vector<128x256xbf16>, vector<16x256xf32> -> vector<16x256xf32>
      %c0_25 = arith.constant 0 : index
      %c0_26 = arith.constant 0 : index
      %36 = vector.load %arg8[%c0_25, %c0_26] : memref<1x256xf32, #tpu.memory_space<vmem>>, vector<1x256xf32>
      %37 = vector.broadcast %36 : vector<1x256xf32> to vector<16x256xf32>
      %38 = arith.addf %35, %37 : vector<16x256xf32>
      %c0_27 = arith.constant 0 : index
      %c0_28 = arith.constant 0 : index
      %39 = vector.load %arg9[%c0_27, %c0_28] : memref<16x256xf32, #tpu.memory_space<vmem>>, vector<16x256xf32>
      tpu.vector_store %arg9[%c0_27, %c0_28], %38 {strides = array<i32>} : memref<16x256xf32, #tpu.memory_space<vmem>>, vector<16x256xf32>,
    } else {
    }
    return
  }
  func.func @transform_0(%arg0: i32, %arg1: i32) -> (i32, i32, i32) {
    %c0_i32 = arith.constant 0 : i32
    %c0_i32_0 = arith.constant 0 : i32
    return %arg0, %arg1, %c0_i32 : i32, i32, i32
  }
  func.func @transform_1(%arg0: i32, %arg1: i32) -> (i32, i32) {
    %c0_i32 = arith.constant 0 : i32
    %c0_i32_0 = arith.constant 0 : i32
    %c0_i32_1 = arith.constant 0 : i32
    return %c0_i32, %c0_i32_0 : i32, i32
  }
  func.func @transform_2(%arg0: i32, %arg1: i32) -> (i32, i32) {
    %c0_i32 = arith.constant 0 : i32
    %c0_i32_0 = arith.constant 0 : i32
    %c0_i32_1 = arith.constant 0 : i32
    return %c0_i32, %c0_i32_0 : i32, i32
  }
  func.func @transform_3(%arg0: i32, %arg1: i32) -> (i32, i32) {
    %c0_i32 = arith.constant 0 : i32
    %c0_i32_0 = arith.constant 0 : i32
    %c0_i32_1 = arith.constant 0 : i32
    return %c0_i32, %c0_i32_0 : i32, i32
  }
  func.func @transform_4(%arg0: i32, %arg1: i32) -> (i32, i32) {
    %c0_i32 = arith.constant 0 : i32
    %c0_i32_0 = arith.constant 0 : i32
    %c0_i32_1 = arith.constant 0 : i32
    return %c0_i32, %c0_i32_0 : i32, i32
  }
  func.func @transform_5(%arg0: i32, %arg1: i32) -> (i32, i32) {
    %c0_i32 = arith.constant 0 : i32
    %c0_i32_0 = arith.constant 0 : i32
    %c0_i32_1 = arith.constant 0 : i32
    return %c0_i32, %c0_i32_0 : i32, i32
  }
  func.func @transform_6(%arg0: i32, %arg1: i32) -> (i32, i32) {
    %c0_i32 = arith.constant 0 : i32
    %c0_i32_0 = arith.constant 0 : i32
    %c0_i32_1 = arith.constant 0 : i32
    return %c0_i32, %c0_i32_0 : i32, i32
  }
  func.func @transform_7(%arg0: i32, %arg1: i32) -> (i32, i32) {
    %c0_i32 = arith.constant 0 : i32
    %c0_i32_0 = arith.constant 0 : i32
    return %arg0, %c0_i32 : i32, i32
  }
}

</mosaic_0001>

<bundles_post_ra>
// kernel: tpu_custom_call.1
= control target key start
LH: loop header
LB: loop body
LE: loop exit
PB: predicated region body
PF: predicated region fallthrough
CT: control target
= control target key end

     0   :  { %s3126_s0 = inlined_call_operand.hbm [shape: bf16[32,32,128], index: 0, kind: input, shape index: {}]   ;;  %s3127_s1 = inlined_call_operand.hbm [shape: bf16[128,256], index: 1, kind: input, shape index: {}]   ;;  %s3128_s2 = inlined_call_operand.hbm [shape: f32[1,256], index: 2, kind: input, shape index: {}]   ;;  %s3129_s3 = inlined_call_operand.hbm [shape: bf16[256,128], index: 3, kind: input, shape index: {}]   ;;  %s3130_s4 = inlined_call_operand.vmem [shape: f32[1,128], index: 4, kind: input, shape index: {}]   ;;  %s3131_s5 = inlined_call_operand.hbm [shape: bf16[128,256], index: 5, kind: input, shape index: {}]   ;;  %s3132_s6 = inlined_call_operand.vmem [shape: f32[1,256], index: 6, kind: input, shape index: {}]   ;;  %s3133_s7 = inlined_call_operand.hbm [shape: f32[32,256], index: 7, kind: output, shape index: {}]  }
   0x1   :  { %3142 = sst [smem:[#allocation29_spill]] %s3127_s1 }
   0x2   :  { %3143 = sst [smem:[#allocation30_spill]] %s3129_s3 }
   0x3   :  { %3144 = sst [smem:[#allocation31_spill]] %s3130_s4 }
   0x4   :  { %3145 = sst [smem:[#allocation32_spill]] %s3132_s6 }
   0x5   :  { %3146 = sst [smem:[#allocation33_spill]] %s3133_s7 }
   0x6   :  { %12 = vsyncpa [#allocation4], 0 }
   0x7   :  { %14 = vsyncpa [#allocation4 + $0x1], 0 }
   0x8   :  { %15 = vsyncpa [#allocation7], 0 }
   0x9   :  { %16 = vsyncpa [#allocation10], 0 }
   0xa   :  { %17 = vsyncpa [#allocation5], 0 }
   0xb   :  { %19 = vsyncpa [#allocation5 + $0x1], 0  ;;  %s2621_s24 = smov 0   ;;  %s2623_s25 = smov 0  }
   0xc   :  { %s2625_s26 = smov 0   ;;  %s2627_s27 = smov 0  }
   0xd   :  { %s2629_s28 = smov 0   ;;  %s2631_s29 = smov 0  }
   0xe   :  { %s2633_s30 = smov 0   ;;  %s2635_s8 = smov 0  }
   0xf   :  { %s2637_s9 = smov 0   ;;  %s2639_s10 = smov 0  }
  0x10   :  { %s2641_s11 = smov 0  }
  0x11 LB: > { %3147 = sst [smem:[#allocation20_spill]] %s2523_s24  ;;  %s1785_s12 = sadd.s32 4294967295, %s2563_s11   ;;  %s2563_s11 = sphi %s2641_s11, %s25_s11   ;;  %s2559_s10 = sphi %s2639_s10, %s3185_s10   ;;  %s2555_s9 = sphi %s2637_s9, %s3184_s9   ;;  %s2551_s8 = sphi %s2635_s8, %s3183_s8   ;;  %s2547_s30 = sphi %s2633_s30, %s3182_s30   ;;  %s2543_s29 = sphi %s2631_s29, %s3181_s29   ;;  %s2539_s28 = sphi %s2629_s28, %s3180_s28   ;;  %s2535_s27 = sphi %s2627_s27, %s3179_s27   ;;  %s2531_s26 = sphi %s2625_s26, %s3173_s26   ;;  %s2527_s25 = sphi %s2623_s25, %s3178_s25   ;;  %s2523_s24 = sphi %s2621_s24, %s3177_s24  }
  0x12   : > { %3148 = sst [smem:[#allocation21_spill]] %s2531_s26  ;;  %s1786_s13 = sadd.s32 4294967294, %s2563_s11  }
  0x13   : > { %3149 = sst [smem:[#allocation22_spill]] %s2551_s8  ;;  %s34_s14 = sadd.s32 1, %s2555_s9 }
  0x14   : > { %s37_s15 = sadd.s32 1, %s2559_s10  ;;  %p35_p0 = scmp.ge.s32.totalorder %s34_s14, 2 }
  0x15   : > { %s46_s16 = sadd.s32 1, %s2543_s29  ;;  %p53_p1 = scmp.ne.s32.totalorder %s2543_s29, %s2539_s28 }
  0x16   : > { %p54_p2 = scmp.eq.s32.totalorder %s2563_s11, 0  ;;  %s3187_s14 = smov (%p35_p0, %s34_s14), 0 }
  0x17   : > { %3150 = sst [smem:[#allocation23_spill]] %s3187_s14  ;;  %s3189_s15 = smov (!%p35_p0, %s37_s15), %s2559_s10 }
  0x18   : > { %s42_s17 = ssub.s32 %s2555_s9, %s3187_s14  ;;  %p2687_p3 = por %p54_p2, %p53_p1 }
  0x19   : > { %p39_p4 = scmp.ge.s32.totalorder %s3189_s15, 2  ;;  %p59_p5 = scmp.ne.s32.totalorder %s2539_s28, %s2535_s27 }
  0x1a   : > { %p2692_p6 = scmp.eq.s32.totalorder %s1785_s12, 0  ;;  %s198_s20 = sadd.s32 1, %s2531_s26 }
  0x1b   : > { %s3191_s15 = smov (%p39_p4, %s3189_s15), 0  ;;  %p208_p8 = scmp.ne.s32.totalorder %s2531_s26, %s2527_s25 }
  0x1c   : > { %3153 = sst [smem:[#allocation24_spill]] %s3191_s15  ;;  %p2701_p7 = por %p2692_p6, %p59_p5 }
  0x1d   : > { %s41_s22 = ssub.s32 %s2559_s10, %s3191_s15  ;;  %p209_p9 = scmp.eq.s32.totalorder %s1785_s12, 3 }
  0x1e   : > { %s43_s23 = sor.u32 %s42_s17, %s41_s22  ;;  %p196_p10 = scmp.eq.s32.totalorder %s41_s22, 0 }
  0x1f   : > { %p44_p11 = scmp.eq.s32.totalorder %s43_s23, 0  ;;  %p2709_p12 = por %p209_p9, %p208_p8 }
  0x20   : > { %s2714_s14 = scalar_select %p196_p10, %s2531_s26, %s198_s20  }
  0x21   : > { %s3155_s27 = scalar_select %p2709_p12, 1, 0 }
  0x22   : > { %3157 = sst [smem:[#allocation26_spill]] %s2714_s14  ;;  %p214_p13 = scmp.ne.s32.totalorder %s2527_s25, %s2523_s24 }
  0x23   : > { %3156 = sst [smem:[#allocation25_spill]] %s3155_s27  ;;  %p215_p0 = scmp.eq.s32.totalorder %s1786_s13, 3 }
  0x24   : > { %s2717_s7 = scalar_select %p44_p11, %s2543_s29, %s46_s16  }
  0x25   : > { %p1787_p1 = scmp.ge.s32.totalorder %s2563_s11, 1  ;;  %p222_p2 = scmp.lt.s32.totalorder %s2563_s11, 5 }
  0x26   : > { %3158 = sst [smem:[#allocation27_spill]] %s2717_s7  ;;  %p2723_p4 = por %p215_p0, %p214_p13 }
  0x27   : > { %p2727_p5 = pnand %p1787_p1, %p222_p2  ;;  %s3162_s1 = sld [smem:[#allocation29_spill]] }
  0x28   : > { %s3159_s8 = scalar_select %p2723_p4, 1, 0 }
  0x29   : > { %p2182_p8 = pneg %p2727_p5  ;;  %s2565_s16 = smov [#allocation6]  }
  0x2a   : > { %3160 = sst [smem:[#allocation28_spill]] %s3159_s8  ;;  %s235_s13 = sshll.u32 %s2565_s16, 4  ;;  %s236_s13 = int_to_ptr.vmem [resolvable:$true] %s235_s13 }
  0x2b   : > { %p2738_p9 = pnand %p2182_p8, %p2692_p6  ;;  %s3164_s3 = sld [smem:[#allocation30_spill]] }
  0x2c   : > { %s2566_s17 = smov 128   ;;  %s2567_s22 = smov 8  }
  0x2d   : > { %s233_s20 = sshll.u32 %s3162_s1, 4  ;;  %s2568_s1 = smov [#allocation9]   ;;  %s234_s20 = int_to_ptr.hbm [resolvable:$true] %s233_s20 }
  0x2e   : > { %2185 = dma.hbm_to_vmem [thread:$0]  (!%p2738_p9), %s234_s20, 2048, %s236_s13, [#allocation7], %s2566_s17, %s2566_s17, %s2567_s22  }
  0x2f   : > { %s261_s16 = sshll.u32 %s2568_s1, 4  ;;  %s2569_s26 = smov 64   ;;  %s262_s16 = int_to_ptr.vmem [resolvable:$true] %s261_s16 }
  0x30   : > { %s2570_s8 = smov 4   ;;  %s248_s7 = sshll.u32 %s3128_s2, 4  ;;  %s249_s7 = int_to_ptr.hbm [resolvable:$true] %s248_s7 }
  0x31   : > { %s259_s14 = sshll.u32 %s3164_s3, 4  ;;  %s2571_s15 = smov [#allocation8]   ;;  %s260_s14 = int_to_ptr.hbm [resolvable:$true] %s259_s14 }
  0x32   : > { %2191 = dma.hbm_to_vmem [thread:$0]  (!%p2738_p9), %s260_s14, 2048, %s262_s16, [#allocation10], %s2569_s26, %s2569_s26, %s2570_s8  }
  0x33   : > { %s250_s3 = sshll.u32 %s2571_s15, 4  ;;  %s276_s20 = sshll.u32 %s3131_s5, 4  ;;  %s251_s3 = int_to_ptr.vmem [resolvable:$true] %s250_s3  ;;  %s277_s20 = int_to_ptr.hbm [resolvable:$true] %s276_s20 }
  0x34   : > { %2188 = dma.hbm_to_vmem [thread:$0]  (!%p2738_p9), %s249_s7, 32, %s251_s3, [#allocation7]  }
  0x35   : > { %s2572_s1 = smov [#allocation11]   ;;  %p1792_p10 = scmp.ge.s32.totalorder %s2563_s11, 4 }
  0x36   : > { %s278_s13 = sshll.u32 %s2572_s1, 4  ;;  %s279_s13 = int_to_ptr.vmem [resolvable:$true] %s278_s13 }
  0x37   : > { %2194 = dma.hbm_to_vmem [thread:$0]  (!%p2738_p9), %s277_s20, 2048, %s279_s13, [#allocation10], %s2566_s17, %s2566_s17, %s2567_s22  }
  0x38   : > { %291 = sbr.rel (%p1792_p10) target bundleno = 77 (0x4d), region = 40 }
  0x3d   : > { %s295_s24 = sand.u32 1, %s2543_s29   ;;  %s1795_s4 = sshll.u32 %s2555_s9, 1 }
  0x3e   : > { %s1793_s6 = sshll.u32 %s295_s24, 7  ;;  %s2072_s3 = sshll.u32 %s2559_s10, 6 }
  0x3f   : > { %s305_s26 = sadd.s32 %s2072_s3, %s1795_s4  ;;  %s299_s14 = scalar_lea.vmem [#allocation3], %s1793_s6 }
  0x40   : > { %s1797_s8 = sshll.u32 %s305_s26, 2  ;;  %s322_s27 = sshll.u32 %s299_s14, 4  ;;  %s323_s27 = int_to_ptr.vmem [resolvable:$true] %s322_s27 }
  0x41   : > { %s307_s22 = scalar_lea.hbm %s3126_s0, %s1797_s8  ;;  %s2573_s7 = smov 256  }
  0x42   : > { %s2163_s16 = scalar_select %p2687_p3, [#allocation0], [#allocation15] }
  0x43   : > { %2164 = sst [smem:[#allocation14]] (%p2687_p3), %s2573_s7  ;;  %s320_s20 = sshll.u32 %s307_s22, 4  ;;  %s321_s20 = int_to_ptr.hbm [resolvable:$true] %s320_s20 }
  0x44   : > { %s312_s15 = sld [smem:[%s2163_s16]]   ;;  %s2574_s1 = smov 128  }
  0x45   : > { %2165 = sst [smem:[#allocation14 + $0x1]] (%p2687_p3), %s2574_s1  ;;  %s2575_s13 = smov 2  }
  0x46   : > { %2166 = sst [smem:[#allocation14 + $0x2]] (%p2687_p3), %s2575_s13  ;;  %s2576_s4 = smov 64  }
  0x47   : > { %2167 = sst [smem:[#allocation14 + $0x3]] (%p2687_p3), %s2576_s4  ;;  %s2577_s3 = smov 4  }
  0x48   : > { %2168 = sst [smem:[#allocation14 + $0x4]] (%p2687_p3), %s2576_s4  ;;  %s296_s8 = scalar_lea.sflag [#allocation4], %s295_s24 }
  0x49   : > { %2169 = sst [smem:[#allocation14 + $0x5]] (%p2687_p3), %s2577_s3  ;;  %s2578_s14 = smov [#allocation13]  }
  0x4a   : > { %s1798_s6 = sshll.u32 %s312_s15, 26 }
  0x4b   : > { %s1799_s26 = sadd.s32 134217728, %s1798_s6 }
  0x4c   : > { %2170 = dma.general (%p2687_p3), %s321_s20, 2048, %s323_s27, %s296_s8, %s2578_s14, [#allocation14], %s1799_s26, 0  }
  0x4d PF: > { %347 = sbr.rel (%p2727_p5) target bundleno = 776 (0x308), region = 48  ;;  %s349_s23 = sand.u32 (!%p2727_p5), 1, %s2539_s28  }
  0x4e   : > { %s1801_s17 = sshll.u32 (!%p2727_p5), %s349_s23, 7  ;;  %s350_s22 = scalar_lea.sflag (!%p2727_p5), [#allocation4], %s349_s23 }
  0x4f   : > { %s2785_s16 = scalar_lea.vmem (!%p2727_p5), [#allocation3], %s1801_s17 }
  0x52   : > { %2506 = dma.done.wait (%p2701_p7), %s350_s22, 2048  }
  0x53   : > { %2508 = vsyncadd (%p2701_p7), %s350_s22, 4294965248 }
  0x54   : > { %2510 = dma.done.wait (%p2692_p6), [#allocation7], 2080  }
  0x55   : > { %2512 = vsyncadd (%p2692_p6), [#allocation7], 4294965216 }
  0x56   : > { %2514 = dma.done.wait (%p2692_p6), [#allocation10], 4096  }
  0x57   : > { %2516 = vsyncadd (%p2692_p6), [#allocation10], 4294963200  ;;  %s402_s18 = sand.u32 1, %s2527_s25   ;;  %v1929_v0 = vld [vmem:[#allocation6 + $0x70] sm:$0xf]  ;;  %v2073_v48 = vld [vmem:[%s2785_s16] sm:$0xff] }
  0x58   : > { %s2802_s12 = sshll.u32 %s402_s18, 5  ;;  %v2104_v1 = vld [vmem:[#allocation6 + $0x74] sm:$0xf0]  ;;  %v2103_v2 = vld [vmem:[#allocation6 + $0x74] sm:$0xf]  ;;  %v2081_v49 = vld [vmem:[%s2785_s16 + $0x40] sm:$0xff] }
  0x59   : > { %v1930_v3 = vor.u32 %v2104_v1, %v1929_v0  ;;  %v1931_v4 = vld [vmem:[#allocation6 + $0x78] sm:$0xf0]  ;;  %v1921_v5 = vld [vmem:[#allocation6 + $0x60] sm:$0xf]  ;;  %v2102_v6 = vld [vmem:[#allocation6 + $0x64] sm:$0xf0] }
  0x5a   : > { %v1934_v7 = vor.u32 %v2103_v2, %v1931_v4  ;;  %v2101_v8 = vld [vmem:[#allocation6 + $0x64] sm:$0xf]  ;;  %v1923_v9 = vld [vmem:[#allocation6 + $0x68] sm:$0xf0]  ;;  %v1922_v10 = vor.u32 %v2102_v6, %v1921_v5  ;;  %v1913_v12 = vld [vmem:[#allocation6 + $0x50] sm:$0xf] }
  0x5b   : > { %638 = vmatpush.bf16.msra.mxu0 %v1930_v3  ;;  %2139 = vmatpush.bf16.msra.mxu2 %v1930_v3  ;;  %v1926_v11 = vor.u32 %v2101_v8, %v1923_v9  ;;  %v2100_v13 = vld [vmem:[#allocation6 + $0x54] sm:$0xf0]  ;;  %v2099_v14 = vld [vmem:[#allocation6 + $0x54] sm:$0xf]  ;;  %v1915_v15 = vld [vmem:[#allocation6 + $0x58] sm:$0xf0] }
  0x5c   : > { %727 = vmatpush.bf16.msra.mxu1 %v1934_v7  ;;  %2147 = vmatpush.bf16.msra.mxu3 %v1934_v7  ;;  %v1914_v16 = vor.u32 %v2100_v13, %v1913_v12  ;;  %v1918_v17 = vor.u32 %v2099_v14, %v1915_v15  ;;  %v1905_v18 = vld [vmem:[#allocation6 + $0x40] sm:$0xf]  ;;  %v2098_v19 = vld [vmem:[#allocation6 + $0x44] sm:$0xf0]  ;;  %v2097_v20 = vld [vmem:[#allocation6 + $0x44] sm:$0xf] }
  0x5d   : > { %v1907_v21 = vld [vmem:[#allocation6 + $0x48] sm:$0xf0]  ;;  %v1906_v22 = vor.u32 %v2098_v19, %v1905_v18  ;;  %v1897_v24 = vld [vmem:[#allocation6 + $0x30] sm:$0xf]  ;;  %v2096_v25 = vld [vmem:[#allocation6 + $0x34] sm:$0xf0] }
  0x5e   : > { %v1910_v23 = vor.u32 %v2097_v20, %v1907_v21  ;;  %v2095_v26 = vld [vmem:[#allocation6 + $0x34] sm:$0xf]  ;;  %v1899_v27 = vld [vmem:[#allocation6 + $0x38] sm:$0xf0]  ;;  %v1898_v28 = vor.u32 %v2096_v25, %v1897_v24  ;;  %v1889_v30 = vld [vmem:[#allocation6 + $0x20] sm:$0xf] }
  0x5f   : > { %639 = vmatpush.bf16.msra.mxu0 %v1922_v10  ;;  %2140 = vmatpush.bf16.msra.mxu2 %v1922_v10  ;;  %v1902_v29 = vor.u32 %v2095_v26, %v1899_v27  ;;  %v2094_v31 = vld [vmem:[#allocation6 + $0x24] sm:$0xf0]  ;;  %v2093_v32 = vld [vmem:[#allocation6 + $0x24] sm:$0xf]  ;;  %v1891_v33 = vld [vmem:[#allocation6 + $0x28] sm:$0xf0] }
  0x60   : > { %728 = vmatpush.bf16.msra.mxu1 %v1926_v11  ;;  %2148 = vmatpush.bf16.msra.mxu3 %v1926_v11  ;;  %v1890_v34 = vor.u32 %v2094_v31, %v1889_v30  ;;  %v1894_v35 = vor.u32 %v2093_v32, %v1891_v33  ;;  %v1881_v36 = vld [vmem:[#allocation6 + $0x10] sm:$0xf]  ;;  %v2092_v37 = vld [vmem:[#allocation6 + $0x14] sm:$0xf0]  ;;  %v2091_v38 = vld [vmem:[#allocation6 + $0x14] sm:$0xf] }
  0x61   : > { %v1883_v39 = vld [vmem:[#allocation6 + $0x18] sm:$0xf0]  ;;  %v1882_v40 = vor.u32 %v2092_v37, %v1881_v36  ;;  %v1873_v42 = vld [vmem:[#allocation6] sm:$0xf]  ;;  %v2090_v43 = vld [vmem:[#allocation6 + $0x4] sm:$0xf0] }
  0x62   : > { %v1886_v41 = vor.u32 %v2091_v38, %v1883_v39  ;;  %v2089_v44 = vld [vmem:[#allocation6 + $0x4] sm:$0xf]  ;;  %v1875_v45 = vld [vmem:[#allocation6 + $0x8] sm:$0xf0]  ;;  %v1874_v46 = vor.u32 %v2090_v43, %v1873_v42  ;;  %v2075_v52 = vld [vmem:[%s2785_s16 + $0x10] sm:$0xff]  ;;  %s2953_s19 = scalar_lea.vmem [#allocation12], %s2802_s12 }
  0x63   : > { %640 = vmatpush.bf16.msra.mxu0 %v1914_v16  ;;  %2141 = vmatpush.bf16.msra.mxu2 %v1914_v16  ;;  %v1878_v47 = vor.u32 %v2089_v44, %v1875_v45  ;;  %v2074_v50 = vld [vmem:[%s2785_s16 + $0x8] sm:$0xff]  ;;  %v2083_v53 = vld [vmem:[%s2785_s16 + $0x50] sm:$0xff]  ;;  %v2076_v54 = vld [vmem:[%s2785_s16 + $0x18] sm:$0xff]  ;;  %p1935_p3 = scmp.ne.s32.totalorder %s2547_s30, 0 }
  0x64   : > { %729 = vmatpush.bf16.msra.mxu1 %v1918_v17  ;;  %2149 = vmatpush.bf16.msra.mxu3 %v1918_v17  ;;  %v2082_v51 = vld [vmem:[%s2785_s16 + $0x48] sm:$0xff]  ;;  %v2084_v55 = vld [vmem:[%s2785_s16 + $0x58] sm:$0xff]  ;;  %v2077_v56 = vld [vmem:[%s2785_s16 + $0x20] sm:$0xff] }
  0x65   : > { %v2085_v57 = vld [vmem:[%s2785_s16 + $0x60] sm:$0xff]  ;;  %v2078_v58 = vld [vmem:[%s2785_s16 + $0x28] sm:$0xff]  ;;  %v2079_v60 = vld [vmem:[%s2785_s16 + $0x30] sm:$0xff] }
  0x66   : > { %v2086_v59 = vld [vmem:[%s2785_s16 + $0x68] sm:$0xff]  ;;  %v2087_v61 = vld [vmem:[%s2785_s16 + $0x70] sm:$0xff]  ;;  %v2080_v62 = vld [vmem:[%s2785_s16 + $0x38] sm:$0xff] }
  0x67   : > { %641 = vmatpush.bf16.msra.mxu0 %v1906_v22  ;;  %2142 = vmatpush.bf16.msra.mxu2 %v1906_v22  ;;  %v2088_v63 = vld [vmem:[%s2785_s16 + $0x78] sm:$0xff]  ;;  %v456_v0 = vld [vmem:[#allocation8] sm:$0x3] }
  0x68   : > { %730 = vmatpush.bf16.msra.mxu1 %v1910_v23  ;;  %2150 = vmatpush.bf16.msra.mxu3 %v1910_v23  ;;  %v2820_v2 = vperm.slane %v456_v0, 0  ;;  %v2822_v4 = vperm.slane %v456_v0, 1 }
  0x6b   : > { %642 = vmatpush.bf16.msra.mxu0 %v1898_v28  ;;  %2143 = vmatpush.bf16.msra.mxu2 %v1898_v28 }
  0x6c   : > { %731 = vmatpush.bf16.msra.mxu1 %v1902_v29  ;;  %2151 = vmatpush.bf16.msra.mxu3 %v1902_v29 }
  0x6f   : > { %643 = vmatpush.bf16.msra.mxu0 %v1890_v34  ;;  %2144 = vmatpush.bf16.msra.mxu2 %v1890_v34 }
  0x70   : > { %732 = vmatpush.bf16.msra.mxu1 %v1894_v35  ;;  %2152 = vmatpush.bf16.msra.mxu3 %v1894_v35 }
  0x73   : > { %644 = vmatpush.bf16.msra.mxu0 %v1882_v40  ;;  %2145 = vmatpush.bf16.msra.mxu2 %v1882_v40 }
  0x74   : > { %733 = vmatpush.bf16.msra.mxu1 %v1886_v41  ;;  %2153 = vmatpush.bf16.msra.mxu3 %v1886_v41 }
  0x77   : > { %645 = vmatpush.bf16.msra.mxu0 %v1874_v46  ;;  %2146 = vmatpush.bf16.msra.mxu2 %v1874_v46 }
  0x78   : > { %734 = vmatpush.bf16.msra.mxu1 %v1878_v47  ;;  %2154 = vmatpush.bf16.msra.mxu3 %v1878_v47 }
  0x7a   : > { %646 = vmatmul.bf16.vlgmr.msra.gmra.mxu0 %v2073_v48  ;;  %686 = vmatmul.bf16.vlgmr.msra.gmra.mxu2 %v2081_v49 }
  0x7b   : > { %735 = vmatmul.bf16.vlgmr.msra.gmra.mxu1 %v2073_v48  ;;  %775 = vmatmul.bf16.vlgmr.msra.gmra.mxu3 %v2081_v49 }
  0x8a   : > { %651 = vmatmul.bf16.gmra.mxu0 %v2074_v50  ;;  %691 = vmatmul.bf16.gmra.mxu2 %v2082_v51 }
  0x8b   : > { %740 = vmatmul.bf16.gmra.mxu1 %v2074_v50  ;;  %780 = vmatmul.bf16.gmra.mxu3 %v2082_v51 }
  0x9a   : > { %656 = vmatmul.bf16.gmra.mxu0 %v2075_v52  ;;  %696 = vmatmul.bf16.gmra.mxu2 %v2083_v53 }
  0x9b   : > { %745 = vmatmul.bf16.gmra.mxu1 %v2075_v52  ;;  %785 = vmatmul.bf16.gmra.mxu3 %v2083_v53 }
  0xaa   : > { %661 = vmatmul.bf16.gmra.mxu0 %v2076_v54  ;;  %701 = vmatmul.bf16.gmra.mxu2 %v2084_v55 }
  0xab   : > { %750 = vmatmul.bf16.gmra.mxu1 %v2076_v54  ;;  %790 = vmatmul.bf16.gmra.mxu3 %v2084_v55 }
  0xba   : > { %666 = vmatmul.bf16.gmra.mxu0 %v2077_v56  ;;  %706 = vmatmul.bf16.gmra.mxu2 %v2085_v57 }
  0xbb   : > { %755 = vmatmul.bf16.gmra.mxu1 %v2077_v56  ;;  %795 = vmatmul.bf16.gmra.mxu3 %v2085_v57 }
  0xca   : > { %671 = vmatmul.bf16.gmra.mxu0 %v2078_v58  ;;  %711 = vmatmul.bf16.gmra.mxu2 %v2086_v59 }
  0xcb   : > { %760 = vmatmul.bf16.gmra.mxu1 %v2078_v58  ;;  %800 = vmatmul.bf16.gmra.mxu3 %v2086_v59 }
  0xda   : > { %676 = vmatmul.bf16.gmra.mxu0 %v2079_v60  ;;  %716 = vmatmul.bf16.gmra.mxu2 %v2087_v61 }
  0xdb   : > { %765 = vmatmul.bf16.gmra.mxu1 %v2079_v60  ;;  %805 = vmatmul.bf16.gmra.mxu3 %v2087_v61 }
  0xea   : > { %681 = vmatmul.bf16.gmra.mxu0 %v2080_v62  ;;  %721 = vmatmul.bf16.gmra.mxu2 %v2088_v63 }
  0xeb   : > { %770 = vmatmul.bf16.gmra.mxu1 %v2080_v62  ;;  %810 = vmatmul.bf16.gmra.mxu3 %v2088_v63 }
  0xf7   : > { %v647_v1 = vpop.f32.mrf.mxu0 }
  0xf8   : > { %v736_v3 = vpop.f32.mrf.mxu1  ;;  %v648_v5 = vadd.f32 %v647_v1, %v2820_v2 }
  0xf9   : > { %v737_v6 = vadd.f32 %v736_v3, %v2822_v4 }
  0xfa   : > { %v816_v10 = vmax.f32 %v648_v5, 0.0 }
  0xfb   : > { %v817_v13 = vmax.f32 %v737_v6, 0.0 }
  0xfc   : > { %v880_v19 = vmin.f32 %v816_v10, 6.0 }
  0xfd   : > { %v687_v7 = vpop.f32.mrf.mxu2  ;;  %v881_v21 = vmin.f32 %v817_v13, 6.0 }
  0xfe   : > { %v776_v8 = vpop.f32.mrf.mxu3  ;;  %v688_v15 = vadd.f32 %v687_v7, %v2820_v2 }
  0xff   : > { %v649_v9 = vpop.f32.mrf.mxu0  ;;  %v777_v17 = vadd.f32 %v776_v8, %v2822_v4 }
 0x100   : > { %v650_v11 = vadd.f32 %v649_v9, %v2820_v2  ;;  %v738_v12 = vpop.f32.mrf.mxu1  ;;  %v848_v24 = vmax.f32 %v688_v15, 0.0 }
 0x101   : > { %v739_v14 = vadd.f32 %v738_v12, %v2822_v4  ;;  %v849_v28 = vmax.f32 %v777_v17, 0.0 }
 0x102   : > { %v818_v16 = vmax.f32 %v650_v11, 0.0  ;;  %v912_v37 = vmin.f32 %v848_v24, 6.0 }
 0x103   : > { %v819_v18 = vmax.f32 %v739_v14, 0.0  ;;  %v913_v40 = vmin.f32 %v849_v28, 6.0 }
 0x104   : > { %v882_v20 = vmin.f32 %v818_v16, 6.0 }
 0x105   : > { %v883_v22 = vmin.f32 %v819_v18, 6.0  ;;  %v689_v23 = vpop.f32.mrf.mxu2 }
 0x106   : > { %v944_v25 = vmax.f32 %v880_v19, %v882_v20  ;;  %v690_v26 = vadd.f32 %v689_v23, %v2820_v2  ;;  %v778_v27 = vpop.f32.mrf.mxu3 }
 0x107   : > { %v951_v29 = vmax.f32 %v881_v21, %v883_v22  ;;  %v779_v30 = vadd.f32 %v778_v27, %v2822_v4  ;;  %v652_v31 = vpop.f32.mrf.mxu0 }
 0x108   : > { %v945_v32 = vrot.slane %v944_v25, 4  ;;  %v850_v33 = vmax.f32 %v690_v26, 0.0  ;;  %v741_v34 = vpop.f32.mrf.mxu1  ;;  %v653_v45 = vadd.f32 %v652_v31, %v2820_v2 }
 0x109   : > { %v952_v35 = vrot.slane %v951_v29, 4  ;;  %v851_v36 = vmax.f32 %v779_v30, 0.0  ;;  %v742_v48 = vadd.f32 %v741_v34, %v2822_v4 }
 0x10a   : > { %v946_v38 = vmax.f32 %v944_v25, %v945_v32  ;;  %v914_v39 = vmin.f32 %v850_v33, 6.0  ;;  %v820_v58 = vmax.f32 %v653_v45, 0.0 }
 0x10b   : > { %v953_v41 = vmax.f32 %v951_v29, %v952_v35  ;;  %v915_v42 = vmin.f32 %v851_v36, 6.0  ;;  %v821_v63 = vmax.f32 %v742_v48, 0.0 }
 0x10c   : > { %v947_v43 = vrot.slane %v946_v38, 2  ;;  %v1056_v44 = vmax.f32 %v912_v37, %v914_v39  ;;  %v884_v12 = vmin.f32 %v820_v58, 6.0 }
 0x10d   : > { %v954_v46 = vrot.slane %v953_v41, 2  ;;  %v1063_v47 = vmax.f32 %v913_v40, %v915_v42  ;;  %v692_v49 = vpop.f32.mrf.mxu2  ;;  %v885_v15 = vmin.f32 %v821_v63, 6.0 }
 0x10e   : > { %v948_v50 = vmax.f32 %v946_v38, %v947_v43  ;;  %v1057_v51 = vrot.slane %v1056_v44, 4  ;;  %v781_v52 = vpop.f32.mrf.mxu3  ;;  %v693_v5 = vadd.f32 %v692_v49, %v2820_v2 }
 0x10f   : > { %v955_v53 = vmax.f32 %v953_v41, %v954_v46  ;;  %v1064_v54 = vrot.slane %v1063_v47, 4  ;;  %v654_v55 = vpop.f32.mrf.mxu0  ;;  %v782_v9 = vadd.f32 %v781_v52, %v2822_v4 }
 0x110   : > { %v949_v56 = vrot.slane %v948_v50, 1  ;;  %v1058_v57 = vmax.f32 %v1056_v44, %v1057_v51  ;;  %v655_v59 = vadd.f32 %v654_v55, %v2820_v2  ;;  %v743_v60 = vpop.f32.mrf.mxu1  ;;  %v852_v19 = vmax.f32 %v693_v5, 0.0 }
 0x111   : > { %v956_v61 = vrot.slane %v955_v53, 1  ;;  %v1065_v62 = vmax.f32 %v1063_v47, %v1064_v54  ;;  %v744_v0 = vadd.f32 %v743_v60, %v2822_v4  ;;  %v853_v24 = vmax.f32 %v782_v9, 0.0 }
 0x112   : > { %v2836_v1 = vmax.f32 %v948_v50, %v949_v56  ;;  %v1059_v3 = vrot.slane %v1058_v57, 2  ;;  %v822_v6 = vmax.f32 %v655_v59, 0.0  ;;  %v916_v35 = vmin.f32 %v852_v19, 6.0 }
 0x113   : > { %v2839_v7 = vmax.f32 %v955_v53, %v956_v61  ;;  %v1066_v8 = vrot.slane %v1065_v62, 2  ;;  %v823_v10 = vmax.f32 %v744_v0, 0.0  ;;  %v917_v38 = vmin.f32 %v853_v24, 6.0 }
 0x114   : > { %v1060_v11 = vmax.f32 %v1058_v57, %v1059_v3  ;;  %v886_v13 = vmin.f32 %v822_v6, 6.0 }
 0x115   : > { %v1067_v14 = vmax.f32 %v1065_v62, %v1066_v8  ;;  %v887_v16 = vmin.f32 %v823_v10, 6.0  ;;  %v694_v17 = vpop.f32.mrf.mxu2 }
 0x116   : > { %v1061_v18 = vrot.slane %v1060_v11, 1  ;;  %v958_v20 = vmax.f32 %v884_v12, %v886_v13  ;;  %v695_v21 = vadd.f32 %v694_v17, %v2820_v2  ;;  %v783_v22 = vpop.f32.mrf.mxu3 }
 0x117   : > { %v1068_v23 = vrot.slane %v1067_v14, 1  ;;  %v965_v25 = vmax.f32 %v885_v15, %v887_v16  ;;  %v784_v26 = vadd.f32 %v783_v22, %v2822_v4  ;;  %v657_v27 = vpop.f32.mrf.mxu0 }
 0x118   : > { %v2844_v28 = vmax.f32 %v1060_v11, %v1061_v18  ;;  %v959_v29 = vrot.slane %v958_v20, 4  ;;  %v854_v30 = vmax.f32 %v695_v21, 0.0  ;;  %v746_v31 = vpop.f32.mrf.mxu1  ;;  %v658_v43 = vadd.f32 %v657_v27, %v2820_v2 }
 0x119   : > { %v2846_v32 = vmax.f32 %v1067_v14, %v1068_v23  ;;  %v966_v33 = vrot.slane %v965_v25, 4  ;;  %v855_v34 = vmax.f32 %v784_v26, 0.0  ;;  %v747_v46 = vadd.f32 %v746_v31, %v2822_v4 }
 0x11a   : > { %v960_v36 = vmax.f32 %v958_v20, %v959_v29  ;;  %v918_v37 = vmin.f32 %v854_v30, 6.0  ;;  %v824_v56 = vmax.f32 %v658_v43, 0.0 }
 0x11b   : > { %v967_v39 = vmax.f32 %v965_v25, %v966_v33  ;;  %v919_v40 = vmin.f32 %v855_v34, 6.0  ;;  %v825_v61 = vmax.f32 %v747_v46, 0.0 }
 0x11c   : > { %v961_v41 = vrot.slane %v960_v36, 2  ;;  %v1070_v42 = vmax.f32 %v916_v35, %v918_v37  ;;  %v888_v12 = vmin.f32 %v824_v56, 6.0 }
 0x11d   : > { %v968_v44 = vrot.slane %v967_v39, 2  ;;  %v1077_v45 = vmax.f32 %v917_v38, %v919_v40  ;;  %v697_v47 = vpop.f32.mrf.mxu2  ;;  %v889_v15 = vmin.f32 %v825_v61, 6.0 }
 0x11e   : > { %v962_v48 = vmax.f32 %v960_v36, %v961_v41  ;;  %v1071_v49 = vrot.slane %v1070_v42, 4  ;;  %v786_v50 = vpop.f32.mrf.mxu3  ;;  %v698_v3 = vadd.f32 %v697_v47, %v2820_v2 }
 0x11f   : > { %v969_v51 = vmax.f32 %v967_v39, %v968_v44  ;;  %v1078_v52 = vrot.slane %v1077_v45, 4  ;;  %v659_v53 = vpop.f32.mrf.mxu0  ;;  %v787_v9 = vadd.f32 %v786_v50, %v2822_v4 }
 0x120   : > { %v963_v54 = vrot.slane %v962_v48, 1  ;;  %v1072_v55 = vmax.f32 %v1070_v42, %v1071_v49  ;;  %v660_v57 = vadd.f32 %v659_v53, %v2820_v2  ;;  %v748_v58 = vpop.f32.mrf.mxu1  ;;  %v856_v19 = vmax.f32 %v698_v3, 0.0 }
 0x121   : > { %v970_v59 = vrot.slane %v969_v51, 1  ;;  %v1079_v60 = vmax.f32 %v1077_v45, %v1078_v52  ;;  %v749_v62 = vadd.f32 %v748_v58, %v2822_v4  ;;  %v857_v24 = vmax.f32 %v787_v9, 0.0 }
 0x122   : > { %v2852_v63 = vmax.f32 %v962_v48, %v963_v54  ;;  %v1073_v0 = vrot.slane %v1072_v55, 2  ;;  %v826_v5 = vmax.f32 %v660_v57, 0.0  ;;  %v920_v37 = vmin.f32 %v856_v19, 6.0 }
 0x123   : > { %v2855_v6 = vmax.f32 %v969_v51, %v970_v59  ;;  %v1080_v8 = vrot.slane %v1079_v60, 2  ;;  %v827_v10 = vmax.f32 %v749_v62, 0.0  ;;  %v921_v40 = vmin.f32 %v857_v24, 6.0 }
 0x124   : > { %v1074_v11 = vmax.f32 %v1072_v55, %v1073_v0  ;;  %v890_v13 = vmin.f32 %v826_v5, 6.0 }
 0x125   : > { %v1081_v14 = vmax.f32 %v1079_v60, %v1080_v8  ;;  %v891_v16 = vmin.f32 %v827_v10, 6.0  ;;  %v699_v17 = vpop.f32.mrf.mxu2 }
 0x126   : > { %v1075_v18 = vrot.slane %v1074_v11, 1  ;;  %v972_v20 = vmax.f32 %v888_v12, %v890_v13  ;;  %v700_v21 = vadd.f32 %v699_v17, %v2820_v2  ;;  %v788_v22 = vpop.f32.mrf.mxu3 }
 0x127   : > { %v1082_v23 = vrot.slane %v1081_v14, 1  ;;  %v979_v25 = vmax.f32 %v889_v15, %v891_v16  ;;  %v789_v26 = vadd.f32 %v788_v22, %v2822_v4  ;;  %v662_v27 = vpop.f32.mrf.mxu0 }
 0x128   : > { %v2860_v29 = vmax.f32 %v1074_v11, %v1075_v18  ;;  %v973_v30 = vrot.slane %v972_v20, 4  ;;  %v858_v31 = vmax.f32 %v700_v21, 0.0  ;;  %v751_v33 = vpop.f32.mrf.mxu1  ;;  %v663_v45 = vadd.f32 %v662_v27, %v2820_v2 }
 0x129   : > { %v2862_v34 = vmax.f32 %v1081_v14, %v1082_v23  ;;  %v980_v35 = vrot.slane %v979_v25, 4  ;;  %v859_v36 = vmax.f32 %v789_v26, 0.0  ;;  %v752_v48 = vadd.f32 %v751_v33, %v2822_v4 }
 0x12a   : > { %v974_v38 = vmax.f32 %v972_v20, %v973_v30  ;;  %v922_v39 = vmin.f32 %v858_v31, 6.0  ;;  %v828_v58 = vmax.f32 %v663_v45, 0.0 }
 0x12b   : > { %v981_v41 = vmax.f32 %v979_v25, %v980_v35  ;;  %v923_v42 = vmin.f32 %v859_v36, 6.0  ;;  %v829_v0 = vmax.f32 %v752_v48, 0.0 }
 0x12c   : > { %v975_v43 = vrot.slane %v974_v38, 2  ;;  %v1084_v44 = vmax.f32 %v920_v37, %v922_v39  ;;  %v892_v16 = vmin.f32 %v828_v58, 6.0 }
 0x12d   : > { %v982_v46 = vrot.slane %v981_v41, 2  ;;  %v1091_v47 = vmax.f32 %v921_v40, %v923_v42  ;;  %v702_v49 = vpop.f32.mrf.mxu2  ;;  %v893_v19 = vmin.f32 %v829_v0, 6.0 }
 0x12e   : > { %v976_v50 = vmax.f32 %v974_v38, %v975_v43  ;;  %v1085_v51 = vrot.slane %v1084_v44, 4  ;;  %v791_v52 = vpop.f32.mrf.mxu3  ;;  %v703_v9 = vadd.f32 %v702_v49, %v2820_v2 }
 0x12f   : > { %v983_v53 = vmax.f32 %v981_v41, %v982_v46  ;;  %v1092_v54 = vrot.slane %v1091_v47, 4  ;;  %v664_v55 = vpop.f32.mrf.mxu0  ;;  %v792_v13 = vadd.f32 %v791_v52, %v2822_v4 }
 0x130   : > { %v977_v56 = vrot.slane %v976_v50, 1  ;;  %v1086_v57 = vmax.f32 %v1084_v44, %v1085_v51  ;;  %v665_v59 = vadd.f32 %v664_v55, %v2820_v2  ;;  %v753_v60 = vpop.f32.mrf.mxu1  ;;  %v860_v23 = vmax.f32 %v703_v9, 0.0 }
 0x131   : > { %v984_v61 = vrot.slane %v983_v53, 1  ;;  %v1093_v62 = vmax.f32 %v1091_v47, %v1092_v54  ;;  %v754_v3 = vadd.f32 %v753_v60, %v2822_v4  ;;  %v861_v30 = vmax.f32 %v792_v13, 0.0 }
 0x132   : > { %v2868_v5 = vmax.f32 %v976_v50, %v977_v56  ;;  %v1087_v8 = vrot.slane %v1086_v57, 2  ;;  %v830_v10 = vmax.f32 %v665_v59, 0.0  ;;  %v924_v43 = vmin.f32 %v860_v23, 6.0 }
 0x133   : > { %v2871_v11 = vmax.f32 %v983_v53, %v984_v61  ;;  %v1094_v12 = vrot.slane %v1093_v62, 2  ;;  %v831_v14 = vmax.f32 %v754_v3, 0.0  ;;  %v925_v46 = vmin.f32 %v861_v30, 6.0 }
 0x134   : > { %v1088_v15 = vmax.f32 %v1086_v57, %v1087_v8  ;;  %v894_v17 = vmin.f32 %v830_v10, 6.0 }
 0x135   : > { %v1095_v18 = vmax.f32 %v1093_v62, %v1094_v12  ;;  %v895_v20 = vmin.f32 %v831_v14, 6.0  ;;  %v704_v21 = vpop.f32.mrf.mxu2 }
 0x136   : > { %v1089_v22 = vrot.slane %v1088_v15, 1  ;;  %v986_v24 = vmax.f32 %v892_v16, %v894_v17  ;;  %v705_v25 = vadd.f32 %v704_v21, %v2820_v2  ;;  %v793_v26 = vpop.f32.mrf.mxu3 }
 0x137   : > { %v1096_v27 = vrot.slane %v1095_v18, 1  ;;  %v993_v31 = vmax.f32 %v893_v19, %v895_v20  ;;  %v794_v33 = vadd.f32 %v793_v26, %v2822_v4  ;;  %v667_v35 = vpop.f32.mrf.mxu0 }
 0x138   : > { %v2876_v36 = vmax.f32 %v1088_v15, %v1089_v22  ;;  %v987_v37 = vrot.slane %v986_v24, 4  ;;  %v862_v38 = vmax.f32 %v705_v25, 0.0  ;;  %v756_v39 = vpop.f32.mrf.mxu1  ;;  %v668_v51 = vadd.f32 %v667_v35, %v2820_v2 }
 0x139   : > { %v2878_v40 = vmax.f32 %v1095_v18, %v1096_v27  ;;  %v994_v41 = vrot.slane %v993_v31, 4  ;;  %v863_v42 = vmax.f32 %v794_v33, 0.0  ;;  %v757_v54 = vadd.f32 %v756_v39, %v2822_v4 }
 0x13a   : > { %v988_v44 = vmax.f32 %v986_v24, %v987_v37  ;;  %v926_v45 = vmin.f32 %v862_v38, 6.0  ;;  %v832_v3 = vmax.f32 %v668_v51, 0.0 }
 0x13b   : > { %v995_v47 = vmax.f32 %v993_v31, %v994_v41  ;;  %v927_v48 = vmin.f32 %v863_v42, 6.0  ;;  %v833_v13 = vmax.f32 %v757_v54, 0.0 }
 0x13c   : > { %v989_v49 = vrot.slane %v988_v44, 2  ;;  %v1098_v50 = vmax.f32 %v924_v43, %v926_v45  ;;  %v896_v24 = vmin.f32 %v832_v3, 6.0 }
 0x13d   : > { %v996_v52 = vrot.slane %v995_v47, 2  ;;  %v1105_v53 = vmax.f32 %v925_v46, %v927_v48  ;;  %v707_v55 = vpop.f32.mrf.mxu2  ;;  %v897_v27 = vmin.f32 %v833_v13, 6.0 }
 0x13e   : > { %v990_v56 = vmax.f32 %v988_v44, %v989_v49  ;;  %v1099_v57 = vrot.slane %v1098_v50, 4  ;;  %v796_v58 = vpop.f32.mrf.mxu3  ;;  %v708_v17 = vadd.f32 %v707_v55, %v2820_v2 }
 0x13f   : > { %v997_v59 = vmax.f32 %v995_v47, %v996_v52  ;;  %v1106_v60 = vrot.slane %v1105_v53, 4  ;;  %v669_v61 = vpop.f32.mrf.mxu0  ;;  %v797_v21 = vadd.f32 %v796_v58, %v2822_v4 }
 0x140   : > { %v991_v62 = vrot.slane %v990_v56, 1  ;;  %v1100_v0 = vmax.f32 %v1098_v50, %v1099_v57  ;;  %v670_v8 = vadd.f32 %v669_v61, %v2820_v2  ;;  %v758_v9 = vpop.f32.mrf.mxu1  ;;  %v864_v35 = vmax.f32 %v708_v17, 0.0 }
 0x141   : > { %v998_v10 = vrot.slane %v997_v59, 1  ;;  %v1107_v12 = vmax.f32 %v1105_v53, %v1106_v60  ;;  %v759_v14 = vadd.f32 %v758_v9, %v2822_v4  ;;  %v865_v42 = vmax.f32 %v797_v21, 0.0 }
 0x142   : > { %v2884_v15 = vmax.f32 %v990_v56, %v991_v62  ;;  %v1101_v16 = vrot.slane %v1100_v0, 2  ;;  %v834_v18 = vmax.f32 %v670_v8, 0.0  ;;  %v928_v53 = vmin.f32 %v864_v35, 6.0 }
 0x143   : > { %v2887_v19 = vmax.f32 %v997_v59, %v998_v10  ;;  %v1108_v20 = vrot.slane %v1107_v12, 2  ;;  %v835_v22 = vmax.f32 %v759_v14, 0.0  ;;  %v929_v56 = vmin.f32 %v865_v42, 6.0 }
 0x144   : > { %v1102_v23 = vmax.f32 %v1100_v0, %v1101_v16  ;;  %v898_v25 = vmin.f32 %v834_v18, 6.0 }
 0x145   : > { %v1109_v26 = vmax.f32 %v1107_v12, %v1108_v20  ;;  %v899_v30 = vmin.f32 %v835_v22, 6.0  ;;  %v709_v31 = vpop.f32.mrf.mxu2 }
 0x146   : > { %v1103_v33 = vrot.slane %v1102_v23, 1  ;;  %v1000_v37 = vmax.f32 %v896_v24, %v898_v25  ;;  %v710_v38 = vadd.f32 %v709_v31, %v2820_v2  ;;  %v798_v39 = vpop.f32.mrf.mxu3 }
 0x147   : > { %v1110_v41 = vrot.slane %v1109_v26, 1  ;;  %v1007_v43 = vmax.f32 %v897_v27, %v899_v30  ;;  %v799_v44 = vadd.f32 %v798_v39, %v2822_v4  ;;  %v672_v45 = vpop.f32.mrf.mxu0 }
 0x148   : > { %v2892_v46 = vmax.f32 %v1102_v23, %v1103_v33  ;;  %v1001_v47 = vrot.slane %v1000_v37, 4  ;;  %v866_v48 = vmax.f32 %v710_v38, 0.0  ;;  %v761_v49 = vpop.f32.mrf.mxu1  ;;  %v673_v61 = vadd.f32 %v672_v45, %v2820_v2 }
 0x149   : > { %v2894_v50 = vmax.f32 %v1109_v26, %v1110_v41  ;;  %v1008_v51 = vrot.slane %v1007_v43, 4  ;;  %v867_v52 = vmax.f32 %v799_v44, 0.0  ;;  %v762_v3 = vadd.f32 %v761_v49, %v2822_v4 }
 0x14a   : > { %v1002_v54 = vmax.f32 %v1000_v37, %v1001_v47  ;;  %v930_v55 = vmin.f32 %v866_v48, 6.0  ;;  %v836_v20 = vmax.f32 %v673_v61, 0.0 }
 0x14b   : > { %v1009_v57 = vmax.f32 %v1007_v43, %v1008_v51  ;;  %v931_v58 = vmin.f32 %v867_v52, 6.0  ;;  %v837_v25 = vmax.f32 %v762_v3, 0.0 }
 0x14c   : > { %v1003_v59 = vrot.slane %v1002_v54, 2  ;;  %v1112_v60 = vmax.f32 %v928_v53, %v930_v55  ;;  %v900_v42 = vmin.f32 %v836_v20, 6.0 }
 0x14d   : > { %v1010_v62 = vrot.slane %v1009_v57, 2  ;;  %v1119_v0 = vmax.f32 %v929_v56, %v931_v58  ;;  %v712_v8 = vpop.f32.mrf.mxu2  ;;  %v901_v45 = vmin.f32 %v837_v25, 6.0 }
 0x14e   : > { %v1004_v9 = vmax.f32 %v1002_v54, %v1003_v59  ;;  %v1113_v10 = vrot.slane %v1112_v60, 4  ;;  %v801_v12 = vpop.f32.mrf.mxu3  ;;  %v713_v31 = vadd.f32 %v712_v8, %v2820_v2 }
 0x14f   : > { %v1011_v13 = vmax.f32 %v1009_v57, %v1010_v62  ;;  %v1120_v14 = vrot.slane %v1119_v0, 4  ;;  %v674_v16 = vpop.f32.mrf.mxu0  ;;  %v802_v38 = vadd.f32 %v801_v12, %v2822_v4 }
 0x150   : > { %v1005_v17 = vrot.slane %v1004_v9, 1  ;;  %v1114_v18 = vmax.f32 %v1112_v60, %v1113_v10  ;;  %v675_v21 = vadd.f32 %v674_v16, %v2820_v2  ;;  %v763_v22 = vpop.f32.mrf.mxu1  ;;  %v868_v51 = vmax.f32 %v713_v31, 0.0 }
 0x151   : > { %v1012_v23 = vrot.slane %v1011_v13, 1  ;;  %v1121_v24 = vmax.f32 %v1119_v0, %v1120_v14  ;;  %v764_v26 = vadd.f32 %v763_v22, %v2822_v4  ;;  %v869_v56 = vmax.f32 %v802_v38, 0.0 }
 0x152   : > { %v2900_v27 = vmax.f32 %v1004_v9, %v1005_v17  ;;  %v1115_v30 = vrot.slane %v1114_v18, 2  ;;  %v838_v33 = vmax.f32 %v675_v21, 0.0  ;;  %v932_v10 = vmin.f32 %v868_v51, 6.0 }
 0x153   : > { %v2903_v35 = vmax.f32 %v1011_v13, %v1012_v23  ;;  %v1122_v37 = vrot.slane %v1121_v24, 2  ;;  %v839_v39 = vmax.f32 %v764_v26, 0.0  ;;  %v933_v14 = vmin.f32 %v869_v56, 6.0 }
 0x154   : > { %v1116_v41 = vmax.f32 %v1114_v18, %v1115_v30  ;;  %v902_v43 = vmin.f32 %v838_v33, 6.0 }
 0x155   : > { %v1123_v44 = vmax.f32 %v1121_v24, %v1122_v37  ;;  %v903_v47 = vmin.f32 %v839_v39, 6.0  ;;  %v714_v48 = vpop.f32.mrf.mxu2 }
 0x156   : > { %v1117_v49 = vrot.slane %v1116_v41, 1  ;;  %v1014_v52 = vmax.f32 %v900_v42, %v902_v43  ;;  %v715_v53 = vadd.f32 %v714_v48, %v2820_v2  ;;  %v803_v54 = vpop.f32.mrf.mxu3 }
 0x157   : > { %v1124_v55 = vrot.slane %v1123_v44, 1  ;;  %v1021_v57 = vmax.f32 %v901_v45, %v903_v47  ;;  %v804_v58 = vadd.f32 %v803_v54, %v2822_v4  ;;  %v677_v59 = vpop.f32.mrf.mxu0 }
 0x158   : > { %v2908_v60 = vmax.f32 %v1116_v41, %v1117_v49  ;;  %v1015_v61 = vrot.slane %v1014_v52, 4  ;;  %v870_v62 = vmax.f32 %v715_v53, 0.0  ;;  %v766_v0 = vpop.f32.mrf.mxu1  ;;  %v678_v21 = vadd.f32 %v677_v59, %v2820_v2 }
 0x159   : > { %v2910_v3 = vmax.f32 %v1123_v44, %v1124_v55  ;;  %v1022_v8 = vrot.slane %v1021_v57, 4  ;;  %v871_v9 = vmax.f32 %v804_v58, 0.0  ;;  %v767_v24 = vadd.f32 %v766_v0, %v2822_v4 }
 0x15a   : > { %v1016_v12 = vmax.f32 %v1014_v52, %v1015_v61  ;;  %v934_v13 = vmin.f32 %v870_v62, 6.0  ;;  %v840_v42 = vmax.f32 %v678_v21, 0.0 }
 0x15b   : > { %v1023_v16 = vmax.f32 %v1021_v57, %v1022_v8  ;;  %v935_v17 = vmin.f32 %v871_v9, 6.0  ;;  %v841_v48 = vmax.f32 %v767_v24, 0.0 }
 0x15c   : > { %v1017_v18 = vrot.slane %v1016_v12, 2  ;;  %v1126_v20 = vmax.f32 %v932_v10, %v934_v13  ;;  %v904_v61 = vmin.f32 %v840_v42, 6.0 }
 0x15d   : > { %v1024_v22 = vrot.slane %v1023_v16, 2  ;;  %v1133_v23 = vmax.f32 %v933_v14, %v935_v17  ;;  %v717_v25 = vpop.f32.mrf.mxu2  ;;  %v905_v8 = vmin.f32 %v841_v48, 6.0 }
 0x15e   : > { %v1018_v26 = vmax.f32 %v1016_v12, %v1017_v18  ;;  %v1127_v30 = vrot.slane %v1126_v20, 4  ;;  %v806_v31 = vpop.f32.mrf.mxu3  ;;  %v718_v53 = vadd.f32 %v717_v25, %v2820_v2 }
 0x15f   : > { %v1025_v33 = vmax.f32 %v1023_v16, %v1024_v22  ;;  %v1134_v37 = vrot.slane %v1133_v23, 4  ;;  %v679_v38 = vpop.f32.mrf.mxu0  ;;  %v807_v57 = vadd.f32 %v806_v31, %v2822_v4 }
 0x160   : > { %v1019_v39 = vrot.slane %v1018_v26, 1  ;;  %v1128_v41 = vmax.f32 %v1126_v20, %v1127_v30  ;;  %v680_v43 = vadd.f32 %v679_v38, %v2820_v2  ;;  %v768_v44 = vpop.f32.mrf.mxu1  ;;  %v872_v13 = vmax.f32 %v718_v53, 0.0 }
 0x161   : > { %v1026_v45 = vrot.slane %v1025_v33, 1  ;;  %v1135_v47 = vmax.f32 %v1133_v23, %v1134_v37  ;;  %v769_v49 = vadd.f32 %v768_v44, %v2822_v4  ;;  %v873_v20 = vmax.f32 %v807_v57, 0.0 }
 0x162   : > { %v2916_v51 = vmax.f32 %v1018_v26, %v1019_v39  ;;  %v1129_v52 = vrot.slane %v1128_v41, 2  ;;  %v842_v54 = vmax.f32 %v680_v43, 0.0  ;;  %v936_v38 = vmin.f32 %v872_v13, 6.0 }
 0x163   : > { %v2919_v55 = vmax.f32 %v1025_v33, %v1026_v45  ;;  %v1136_v56 = vrot.slane %v1135_v47, 2  ;;  %v843_v58 = vmax.f32 %v769_v49, 0.0  ;;  %v937_v42 = vmin.f32 %v873_v20, 6.0 }
 0x164   : > { %v1130_v59 = vmax.f32 %v1128_v41, %v1129_v52  ;;  %v906_v62 = vmin.f32 %v842_v54, 6.0 }
 0x165   : > { %v1137_v0 = vmax.f32 %v1135_v47, %v1136_v56  ;;  %v907_v9 = vmin.f32 %v843_v58, 6.0  ;;  %v719_v10 = vpop.f32.mrf.mxu2 }
 0x166   : > { %v1131_v12 = vrot.slane %v1130_v59, 1  ;;  %v1028_v14 = vmax.f32 %v904_v61, %v906_v62  ;;  %v720_v16 = vadd.f32 %v719_v10, %v2820_v2  ;;  %v808_v17 = vpop.f32.mrf.mxu3 }
 0x167   : > { %v1138_v18 = vrot.slane %v1137_v0, 1  ;;  %v1035_v21 = vmax.f32 %v905_v8, %v907_v9  ;;  %v809_v22 = vadd.f32 %v808_v17, %v2822_v4  ;;  %v682_v23 = vpop.f32.mrf.mxu0 }
 0x168   : > { %v2924_v24 = vmax.f32 %v1130_v59, %v1131_v12  ;;  %v1029_v25 = vrot.slane %v1028_v14, 4  ;;  %v874_v26 = vmax.f32 %v720_v16, 0.0  ;;  %v771_v30 = vpop.f32.mrf.mxu1  ;;  %v683_v48 = vadd.f32 %v682_v23, %v2820_v2 }
 0x169   : > { %v2926_v31 = vmax.f32 %v1137_v0, %v1138_v18  ;;  %v1036_v33 = vrot.slane %v1035_v21, 4  ;;  %v875_v37 = vmax.f32 %v809_v22, 0.0  ;;  %v772_v53 = vadd.f32 %v771_v30, %v2822_v4 }
 0x16a   : > { %v1030_v39 = vmax.f32 %v1028_v14, %v1029_v25  ;;  %v938_v41 = vmin.f32 %v874_v26, 6.0  ;;  %v844_v9 = vmax.f32 %v683_v48, 0.0 }
 0x16b   : > { %v1037_v43 = vmax.f32 %v1035_v21, %v1036_v33  ;;  %v939_v44 = vmin.f32 %v875_v37, 6.0  ;;  %v845_v16 = vmax.f32 %v772_v53, 0.0 }
 0x16c   : > { %v1031_v45 = vrot.slane %v1030_v39, 2  ;;  %v1140_v47 = vmax.f32 %v936_v38, %v938_v41  ;;  %v908_v37 = vmin.f32 %v844_v9, 6.0 }
 0x16d   : > { %v1038_v49 = vrot.slane %v1037_v43, 2  ;;  %v1147_v52 = vmax.f32 %v937_v42, %v939_v44  ;;  %v722_v54 = vpop.f32.mrf.mxu2  ;;  %v909_v41 = vmin.f32 %v845_v16, 6.0 }
 0x16e   : > { %v1032_v56 = vmax.f32 %v1030_v39, %v1031_v45  ;;  %v1141_v57 = vrot.slane %v1140_v47, 4  ;;  %v811_v58 = vpop.f32.mrf.mxu3  ;;  %v723_v21 = vadd.f32 %v722_v54, %v2820_v2 }
 0x16f   : > { %v1039_v59 = vmax.f32 %v1037_v43, %v1038_v49  ;;  %v1148_v61 = vrot.slane %v1147_v52, 4  ;;  %v684_v62 = vpop.f32.mrf.mxu0  ;;  %v812_v26 = vadd.f32 %v811_v58, %v2822_v4 }
 0x170   : > { %v1033_v0 = vrot.slane %v1032_v56, 1  ;;  %v1142_v8 = vmax.f32 %v1140_v47, %v1141_v57  ;;  %v685_v10 = vadd.f32 %v684_v62, %v2820_v2  ;;  %v773_v12 = vpop.f32.mrf.mxu1  ;;  %v876_v45 = vmax.f32 %v723_v21, 0.0 }
 0x171   : > { %v1040_v13 = vrot.slane %v1039_v59, 1  ;;  %v1149_v14 = vmax.f32 %v1147_v52, %v1148_v61  ;;  %v774_v17 = vadd.f32 %v773_v12, %v2822_v4  ;;  %v877_v53 = vmax.f32 %v812_v26, 0.0 }
 0x172   : > { %v2932_v18 = vmax.f32 %v1032_v56, %v1033_v0  ;;  %v1143_v20 = vrot.slane %v1142_v8, 2  ;;  %v846_v22 = vmax.f32 %v685_v10, 0.0 }
 0x173   : > { %v2935_v23 = vmax.f32 %v1039_v59, %v1040_v13  ;;  %v1150_v25 = vrot.slane %v1149_v14, 2  ;;  %v847_v30 = vmax.f32 %v774_v17, 0.0  ;;  %v941_v12 = vmin.f32 %v877_v53, 6.0 }
 0x174   : > { %v1144_v33 = vmax.f32 %v1142_v8, %v1143_v20  ;;  %v910_v38 = vmin.f32 %v846_v22, 6.0  ;;  %v940_v8 = vmin.f32 %v876_v45, 6.0 }
 0x175   : > { %v1151_v39 = vmax.f32 %v1149_v14, %v1150_v25  ;;  %v911_v42 = vmin.f32 %v847_v30, 6.0  ;;  %v724_v43 = vpop.f32.mrf.mxu2 }
 0x176   : > { %v1145_v44 = vrot.slane %v1144_v33, 1  ;;  %v1042_v47 = vmax.f32 %v908_v37, %v910_v38  ;;  %v725_v48 = vadd.f32 %v724_v43, %v2820_v2  ;;  %v813_v49 = vpop.f32.mrf.mxu3 }
 0x177   : > { %v1152_v52 = vrot.slane %v1151_v39, 1  ;;  %v1049_v54 = vmax.f32 %v909_v41, %v911_v42  ;;  %v814_v56 = vadd.f32 %v813_v49, %v2822_v4 }
 0x178   : > { %v2940_v57 = vmax.f32 %v1144_v33, %v1145_v44  ;;  %v1043_v58 = vrot.slane %v1042_v47, 4  ;;  %v878_v59 = vmax.f32 %v725_v48, 0.0 }
 0x179   : > { %v2942_v61 = vmax.f32 %v1151_v39, %v1152_v52  ;;  %v1050_v62 = vrot.slane %v1049_v54, 4  ;;  %v879_v0 = vmax.f32 %v814_v56, 0.0 }
 0x17a   : > { %v1044_v9 = vmax.f32 %v1042_v47, %v1043_v58  ;;  %v942_v10 = vmin.f32 %v878_v59, 6.0 }
 0x17b   : > { %v1051_v13 = vmax.f32 %v1049_v54, %v1050_v62  ;;  %v943_v2 = vmin.f32 %v879_v0, 6.0 }
 0x17c   : > { %v1045_v14 = vrot.slane %v1044_v9, 2  ;;  %v1154_v16 = vmax.f32 %v940_v8, %v942_v10 }
 0x17d   : > { %v1052_v17 = vrot.slane %v1051_v13, 2  ;;  %v1161_v20 = vmax.f32 %v941_v12, %v943_v2 }
 0x17e   : > { %v1046_v21 = vmax.f32 %v1044_v9, %v1045_v14  ;;  %v1155_v4 = vrot.slane %v1154_v16, 4 }
 0x17f   : > { %v1053_v22 = vmax.f32 %v1051_v13, %v1052_v17  ;;  %v1162_v25 = vrot.slane %v1161_v20, 4 }
 0x180   : > { %v1047_v26 = vrot.slane %v1046_v21, 1  ;;  %v1156_v30 = vmax.f32 %v1154_v16, %v1155_v4 }
 0x181   : > { %v1054_v33 = vrot.slane %v1053_v22, 1  ;;  %v1163_v37 = vmax.f32 %v1161_v20, %v1162_v25 }
 0x182   : > { %v2944_v38 = vmax.f32 %v1046_v21, %v1047_v26  ;;  %v1157_v39 = vrot.slane %v1156_v30, 2 }
 0x183   : > { %v2946_v41 = vmax.f32 %v1053_v22, %v1054_v33  ;;  %v1164_v42 = vrot.slane %v1163_v37, 2 }
 0x184   : > { %v1158_v43 = vmax.f32 %v1156_v30, %v1157_v39 }
 0x185   : > { %v1165_v44 = vmax.f32 %v1163_v37, %v1164_v42  ;;  %1171 = sbr.rel (%p1935_p3) target bundleno = 406 (0x196), region = 72 }
 0x186   : > { %v1159_v45 = vrot.slane %v1158_v43, 1 }
 0x187   : > { %v1166_v47 = vrot.slane %v1165_v44, 1 }
 0x188   : > { %v2948_v48 = vmax.f32 %v1158_v43, %v1159_v45 }
 0x189   : > { %v2950_v49 = vmax.f32 %v1165_v44, %v1166_v47 }
 0x18a   : > { %vm1204_vm0 = vcmask 1041409   ;;  %vm1206_vm1 = vcmask 1042434   ;;  %vm1208_vm2 = vcmask 1043459   ;;  %vm1210_vm3 = vcmask 1044484  }
 0x18b   : > { %v1205_v52 = vsel %vm1204_vm0, %v2852_v63, %v2836_v1  ;;  %vm1212_vm4 = vcmask 1045509   ;;  %vm1214_vm5 = vcmask 1046534   ;;  %vm1216_vm6 = vcmask 1047559  }
 0x18c   : > { %v1207_v53 = vsel %vm1206_vm1, %v2868_v5, %v1205_v52  ;;  %v1218_v54 = vsel %vm1204_vm0, %v2855_v6, %v2839_v7  ;;  %v1225_v56 = vsel %vm1204_vm0, %v2860_v29, %v2844_v28  ;;  %v1232_v58 = vsel %vm1204_vm0, %v2862_v34, %v2846_v32 }
 0x18d   : > { %v1209_v59 = vsel %vm1208_vm2, %v2884_v15, %v1207_v53  ;;  %v1219_v62 = vsel %vm1206_vm1, %v2871_v11, %v1218_v54  ;;  %v1226_v0 = vsel %vm1206_vm1, %v2876_v36, %v1225_v56  ;;  %v1233_v8 = vsel %vm1206_vm1, %v2878_v40, %v1232_v58 }
 0x18e   : > { %v1211_v9 = vsel %vm1210_vm3, %v2900_v27, %v1209_v59  ;;  %v1220_v10 = vsel %vm1208_vm2, %v2887_v19, %v1219_v62  ;;  %v1227_v12 = vsel %vm1208_vm2, %v2892_v46, %v1226_v0  ;;  %v1234_v13 = vsel %vm1208_vm2, %v2894_v50, %v1233_v8 }
 0x18f   : > { %v1213_v2 = vsel %vm1212_vm4, %v2916_v51, %v1211_v9  ;;  %v1221_v14 = vsel %vm1210_vm3, %v2903_v35, %v1220_v10  ;;  %v1228_v16 = vsel %vm1210_vm3, %v2908_v60, %v1227_v12  ;;  %v1235_v17 = vsel %vm1210_vm3, %v2910_v3, %v1234_v13 }
 0x190   : > { %v1215_v20 = vsel %vm1214_vm5, %v2932_v18, %v1213_v2  ;;  %v1222_v21 = vsel %vm1212_vm4, %v2919_v55, %v1221_v14  ;;  %v1229_v4 = vsel %vm1212_vm4, %v2924_v24, %v1228_v16  ;;  %v1236_v22 = vsel %vm1212_vm4, %v2926_v31, %v1235_v17 }
 0x191   : > { %v1217_v25 = vsel %vm1216_vm6, %v2944_v38, %v1215_v20  ;;  %v1223_v26 = vsel %vm1214_vm5, %v2935_v23, %v1222_v21  ;;  %v1230_v30 = vsel %vm1214_vm5, %v2940_v57, %v1229_v4  ;;  %v1237_v33 = vsel %vm1214_vm5, %v2942_v61, %v1236_v22 }
 0x192   : > { %1243 = vst [vmem:[#allocation2 + $0x10] sm:$0xff] %v1217_v25  ;;  %v1224_v37 = vsel %vm1216_vm6, %v2946_v41, %v1223_v26  ;;  %v1231_v39 = vsel %vm1216_vm6, %v2948_v48, %v1230_v30  ;;  %v1238_v42 = vsel %vm1216_vm6, %v2950_v49, %v1237_v33 }
 0x193   : > { %1244 = vst [vmem:[#allocation2] sm:$0xff] %v1224_v37 }
 0x194   : > { %1245 = vst [vmem:[#allocation2 + $0x18] sm:$0xff] %v1231_v39 }
 0x195   : > { %1246 = vst [vmem:[#allocation2 + $0x8] sm:$0xff] %v1238_v42 }
 0x196 PF: > { %p1936_p6 = scmp.le.s32.totalorder %s2547_s30, 0 }
 0x198   : > { %1250 = sbr.rel (%p1936_p6) target bundleno = 427 (0x1ab), region = 76 }
 0x19d   : > { %vm1287_vm7 = vcmask 1041409   ;;  %vm1289_vm8 = vcmask 1042434   ;;  %vm1291_vm9 = vcmask 1043459   ;;  %vm1293_vm10 = vcmask 1044484  }
 0x19e   : > { %v1288_v43 = vsel %vm1287_vm7, %v2852_v63, %v2836_v1  ;;  %vm1295_vm11 = vcmask 1045509   ;;  %vm1297_vm12 = vcmask 1046534   ;;  %vm1299_vm13 = vcmask 1047559  }
 0x19f   : > { %v1290_v44 = vsel %vm1289_vm8, %v2868_v5, %v1288_v43  ;;  %v1301_v45 = vsel %vm1287_vm7, %v2855_v6, %v2839_v7  ;;  %v1308_v47 = vsel %vm1287_vm7, %v2860_v29, %v2844_v28  ;;  %v1315_v52 = vsel %vm1287_vm7, %v2862_v34, %v2846_v32  ;;  %v1251_v6 = vld [vmem:[#allocation2 + $0x10] sm:$0xff] }
 0x1a0   : > { %v1292_v53 = vsel %vm1291_vm9, %v2884_v15, %v1290_v44  ;;  %v1302_v54 = vsel %vm1289_vm8, %v2871_v11, %v1301_v45  ;;  %v1309_v1 = vsel %vm1289_vm8, %v2876_v36, %v1308_v47  ;;  %v1316_v63 = vsel %vm1289_vm8, %v2878_v40, %v1315_v52  ;;  %v1252_v15 = vld [vmem:[#allocation2] sm:$0xff] }
 0x1a1   : > { %v1294_v5 = vsel %vm1293_vm10, %v2900_v27, %v1292_v53  ;;  %v1303_v7 = vsel %vm1291_vm9, %v2887_v19, %v1302_v54  ;;  %v1310_v28 = vsel %vm1291_vm9, %v2892_v46, %v1309_v1  ;;  %v1317_v32 = vsel %vm1291_vm9, %v2894_v50, %v1316_v63  ;;  %v1253_v46 = vld [vmem:[#allocation2 + $0x18] sm:$0xff]  ;;  %v1254_v27 = vld [vmem:[#allocation2 + $0x8] sm:$0xff] }
 0x1a2   : > { %v1296_v29 = vsel %vm1295_vm11, %v2916_v51, %v1294_v5  ;;  %v1304_v34 = vsel %vm1293_vm10, %v2903_v35, %v1303_v7  ;;  %v1311_v11 = vsel %vm1293_vm10, %v2908_v60, %v1310_v28  ;;  %v1318_v36 = vsel %vm1293_vm10, %v2910_v3, %v1317_v32 }
 0x1a3   : > { %v1298_v40 = vsel %vm1297_vm12, %v2932_v18, %v1296_v29  ;;  %v1305_v19 = vsel %vm1295_vm11, %v2919_v55, %v1304_v34  ;;  %v1312_v50 = vsel %vm1295_vm11, %v2924_v24, %v1311_v11  ;;  %v1319_v35 = vsel %vm1295_vm11, %v2926_v31, %v1318_v36 }
 0x1a4   : > { %v1300_v60 = vsel %vm1299_vm13, %v2944_v38, %v1298_v40  ;;  %v1306_v3 = vsel %vm1297_vm12, %v2935_v23, %v1305_v19  ;;  %v1313_v51 = vsel %vm1297_vm12, %v2940_v57, %v1312_v50  ;;  %v1320_v55 = vsel %vm1297_vm12, %v2942_v61, %v1319_v35 }
 0x1a5   : > { %v1326_v18 = vmax.f32 %v1251_v6, %v1300_v60  ;;  %v1307_v24 = vsel %vm1299_vm13, %v2946_v41, %v1306_v3  ;;  %v1314_v56 = vsel %vm1299_vm13, %v2948_v48, %v1313_v51  ;;  %v1321_v31 = vsel %vm1299_vm13, %v2950_v49, %v1320_v55 }
 0x1a6   : > { %v1327_v38 = vmax.f32 %v1252_v15, %v1307_v24  ;;  %v1328_v58 = vmax.f32 %v1253_v46, %v1314_v56  ;;  %v1329_v59 = vmax.f32 %v1254_v27, %v1321_v31 }
 0x1a7   : > { %1330 = vst [vmem:[#allocation2 + $0x10] sm:$0xff] %v1326_v18 }
 0x1a8   : > { %1331 = vst [vmem:[#allocation2] sm:$0xff] %v1327_v38 }
 0x1a9   : > { %1332 = vst [vmem:[#allocation2 + $0x18] sm:$0xff] %v1328_v58 }
 0x1aa   : > { %1333 = vst [vmem:[#allocation2 + $0x8] sm:$0xff] %v1329_v59 }
 0x1ab PF: > { %p1937_p7 = scmp.ne.s32.totalorder %s2547_s30, 1 }
 0x1ac   : > { %s3165_s24 = sld [smem:[#allocation31_spill]] (!%p1937_p7) }
 0x1ad   : > { %1337 = sbr.rel (%p1937_p7) target bundleno = 754 (0x2f2), region = 80  ;;  %s3166_s15 = sld [smem:[#allocation32_spill]] (!%p1937_p7) }
 0x1b2   : > { %v2112_v23 = vld [vmem:[#allocation9 + $0x38] sm:$0xff]  ;;  %v2111_v61 = vld [vmem:[#allocation9 + $0x30] sm:$0xff]  ;;  %v2110_v48 = vld [vmem:[#allocation9 + $0x28] sm:$0xff] }
 0x1b3   : > { %v2120_v57 = vld [vmem:[#allocation9 + $0x78] sm:$0xff]  ;;  %1476 = vmatpush.bf16.msra.mxu0 %v2112_v23  ;;  %v2119_v41 = vld [vmem:[#allocation9 + $0x70] sm:$0xff]  ;;  %v2118_v49 = vld [vmem:[#allocation9 + $0x68] sm:$0xff] }
 0x1b4   : > { %1490 = vmatpush.bf16.msra.mxu1 %v2120_v57  ;;  %v2060_v62 = vld [vmem:[#allocation11 + $0x70] sm:$0xf]  ;;  %v2136_v0 = vld [vmem:[#allocation11 + $0x74] sm:$0xf0]  ;;  %v2135_v8 = vld [vmem:[#allocation11 + $0x74] sm:$0xf] }
 0x1b5   : > { %v2062_v9 = vld [vmem:[#allocation11 + $0x78] sm:$0xf0]  ;;  %v2061_v10 = vor.u32 %v2136_v0, %v2060_v62  ;;  %v2052_v13 = vld [vmem:[#allocation11 + $0x60] sm:$0xf]  ;;  %v2134_v2 = vld [vmem:[#allocation11 + $0x64] sm:$0xf0] }
 0x1b6   : > { %v2065_v12 = vor.u32 %v2135_v8, %v2062_v9  ;;  %v2133_v14 = vld [vmem:[#allocation11 + $0x64] sm:$0xf]  ;;  %v2054_v16 = vld [vmem:[#allocation11 + $0x68] sm:$0xf0]  ;;  %v2053_v21 = vor.u32 %v2134_v2, %v2052_v13  ;;  %v2044_v22 = vld [vmem:[#allocation11 + $0x50] sm:$0xf] }
 0x1b7   : > { %1477 = vmatpush.bf16.msra.mxu0 %v2111_v61  ;;  %v2109_v17 = vld [vmem:[#allocation9 + $0x20] sm:$0xff]  ;;  %1611 = vmatpush.bf16.msra.mxu2 %v2061_v10  ;;  %v2057_v4 = vor.u32 %v2133_v14, %v2054_v16  ;;  %v2132_v25 = vld [vmem:[#allocation11 + $0x54] sm:$0xf0]  ;;  %v2131_v26 = vld [vmem:[#allocation11 + $0x54] sm:$0xf] }
 0x1b8   : > { %1491 = vmatpush.bf16.msra.mxu1 %v2119_v41  ;;  %v2117_v20 = vld [vmem:[#allocation9 + $0x60] sm:$0xff]  ;;  %1625 = vmatpush.bf16.msra.mxu3 %v2065_v12  ;;  %v2046_v30 = vld [vmem:[#allocation11 + $0x58] sm:$0xf0]  ;;  %v2045_v39 = vor.u32 %v2132_v25, %v2044_v22  ;;  %v2107_v43 = vld [vmem:[#allocation9 + $0x10] sm:$0xff] }
 0x1b9   : > { %v2108_v33 = vld [vmem:[#allocation9 + $0x18] sm:$0xff]  ;;  %v2049_v42 = vor.u32 %v2131_v26, %v2046_v30  ;;  %v2115_v44 = vld [vmem:[#allocation9 + $0x50] sm:$0xff]  ;;  %v2106_v45 = vld [vmem:[#allocation9 + $0x8] sm:$0xff] }
 0x1ba   : > { %v2116_v37 = vld [vmem:[#allocation9 + $0x58] sm:$0xff]  ;;  %v2114_v47 = vld [vmem:[#allocation9 + $0x48] sm:$0xff]  ;;  %v2105_v52 = vld [vmem:[#allocation9] sm:$0xff] }
 0x1bb   : > { %1478 = vmatpush.bf16.msra.mxu0 %v2110_v48  ;;  %1612 = vmatpush.bf16.msra.mxu2 %v2053_v21  ;;  %v2113_v53 = vld [vmem:[#allocation9 + $0x40] sm:$0xff]  ;;  %v1338_v54 = vld [vmem:[#allocation2 + $0x10] sm:$0xff]  ;;  %v1340_v1 = vld [vmem:[#allocation2 + $0x18] sm:$0xff] }
 0x1bc   : > { %1492 = vmatpush.bf16.msra.mxu1 %v2118_v49  ;;  %1626 = vmatpush.bf16.msra.mxu3 %v2057_v4  ;;  %v1339_v63 = vld [vmem:[#allocation2] sm:$0xff]  ;;  %v1341_v5 = vld [vmem:[#allocation2 + $0x8] sm:$0xff]  ;;  %v1342_v7 = vpack.c.bf16 %v1340_v1, %v1338_v54  ;;  %v2028_v40 = vld [vmem:[#allocation11 + $0x30] sm:$0xf] }
 0x1bd   : > { %v1343_v28 = vpack.c.bf16 %v1341_v5, %v1339_v63  ;;  %v2036_v32 = vld [vmem:[#allocation11 + $0x40] sm:$0xf]  ;;  %v2130_v6 = vld [vmem:[#allocation11 + $0x44] sm:$0xf0]  ;;  %v2129_v29 = vld [vmem:[#allocation11 + $0x44] sm:$0xf] }
 0x1be   : > { %v2037_v34 = vor.u32 %v2130_v6, %v2036_v32  ;;  %v2038_v11 = vld [vmem:[#allocation11 + $0x48] sm:$0xf0]  ;;  %v2128_v15 = vld [vmem:[#allocation11 + $0x34] sm:$0xf0]  ;;  %v2127_v19 = vld [vmem:[#allocation11 + $0x34] sm:$0xf] }
 0x1bf   : > { %1479 = vmatpush.bf16.msra.mxu0 %v2109_v17  ;;  %1613 = vmatpush.bf16.msra.mxu2 %v2045_v39  ;;  %v2041_v36 = vor.u32 %v2129_v29, %v2038_v11  ;;  %v2029_v46 = vor.u32 %v2128_v15, %v2028_v40  ;;  %v2030_v50 = vld [vmem:[#allocation11 + $0x38] sm:$0xf0]  ;;  %v2020_v35 = vld [vmem:[#allocation11 + $0x20] sm:$0xf]  ;;  %v2126_v60 = vld [vmem:[#allocation11 + $0x24] sm:$0xf0] }
 0x1c0   : > { %1493 = vmatpush.bf16.msra.mxu1 %v2117_v20  ;;  %1627 = vmatpush.bf16.msra.mxu3 %v2049_v42  ;;  %v2033_v27 = vor.u32 %v2127_v19, %v2030_v50  ;;  %v2125_v3 = vld [vmem:[#allocation11 + $0x24] sm:$0xf]  ;;  %v2021_v51 = vor.u32 %v2126_v60, %v2020_v35  ;;  %v2022_v55 = vld [vmem:[#allocation11 + $0x28] sm:$0xf0]  ;;  %v2012_v24 = vld [vmem:[#allocation11 + $0x10] sm:$0xf] }
 0x1c1   : > { %v2025_v18 = vor.u32 %v2125_v3, %v2022_v55  ;;  %v2124_v56 = vld [vmem:[#allocation11 + $0x14] sm:$0xf0]  ;;  %v2123_v31 = vld [vmem:[#allocation11 + $0x14] sm:$0xf]  ;;  %v2014_v58 = vld [vmem:[#allocation11 + $0x18] sm:$0xf0] }
 0x1c2   : > { %v2013_v38 = vor.u32 %v2124_v56, %v2012_v24  ;;  %v2017_v59 = vor.u32 %v2123_v31, %v2014_v58  ;;  %v2004_v23 = vld [vmem:[#allocation11] sm:$0xf]  ;;  %v2122_v57 = vld [vmem:[#allocation11 + $0x4] sm:$0xf0]  ;;  %v2121_v61 = vld [vmem:[#allocation11 + $0x4] sm:$0xf] }
 0x1c3   : > { %1480 = vmatpush.bf16.msra.mxu0 %v2108_v33  ;;  %1614 = vmatpush.bf16.msra.mxu2 %v2037_v34  ;;  %v2005_v41 = vor.u32 %v2122_v57, %v2004_v23  ;;  %v2006_v48 = vld [vmem:[#allocation11 + $0x8] sm:$0xf0]  ;;  %v2312_v62 = vld [vmem:[%s3165_s24] ss:$0 sm:$0xff] }
 0x1c4   : > { %1494 = vmatpush.bf16.msra.mxu1 %v2116_v37  ;;  %1628 = vmatpush.bf16.msra.mxu3 %v2041_v36  ;;  %v2009_v49 = vor.u32 %v2121_v61, %v2006_v48  ;;  %v1525_v22 = vld [vmem:[%s3166_s15] sm:$0x3] }
 0x1c5   : > { %v1527_v25 = vperm.slane %v1525_v22, 0  ;;  %v1528_v26 = vperm.slane %v1525_v22, 1 }
 0x1c7   : > { %1481 = vmatpush.bf16.msra.mxu0 %v2107_v43  ;;  %1615 = vmatpush.bf16.msra.mxu2 %v2029_v46 }
 0x1c8   : > { %1495 = vmatpush.bf16.msra.mxu1 %v2115_v44  ;;  %1629 = vmatpush.bf16.msra.mxu3 %v2033_v27 }
 0x1cb   : > { %1482 = vmatpush.bf16.msra.mxu0 %v2106_v45  ;;  %1616 = vmatpush.bf16.msra.mxu2 %v2021_v51 }
 0x1cc   : > { %1496 = vmatpush.bf16.msra.mxu1 %v2114_v47  ;;  %1630 = vmatpush.bf16.msra.mxu3 %v2025_v18 }
 0x1cf   : > { %1483 = vmatpush.bf16.msra.mxu0 %v2105_v52  ;;  %1617 = vmatpush.bf16.msra.mxu2 %v2013_v38 }
 0x1d0   : > { %1497 = vmatpush.bf16.msra.mxu1 %v2113_v53  ;;  %1631 = vmatpush.bf16.msra.mxu3 %v2017_v59 }
 0x1d2   : > { %1484 = vmatmul.bf16.vlgmr.msra.gmra.mxu0 %v1342_v7 }
 0x1d3   : > { %1498 = vmatmul.bf16.vlgmr.msra.gmra.mxu1 %v1343_v28  ;;  %1618 = vmatpush.bf16.msra.mxu2 %v2005_v41 }
 0x1d4   : > { %1632 = vmatpush.bf16.msra.mxu3 %v2009_v49 }
 0x24f   : > { %v1485_v0 = vpop.f32.mrf.mxu0 }
 0x250   : > { %v1499_v8 = vpop.f32.mrf.mxu1  ;;  %v1486_v9 = vadd.f32 %v2312_v62, %v1485_v0 }
 0x252   : > { %v1500_v10 = vadd.f32 %v1499_v8, %v1486_v9 }
 0x254   : > { %v1504_v14 = vmax.f32 %v1500_v10, 0.0 }
 0x256   : > { %v1506_v20 = vmin.f32 %v1504_v14, 6.0 }
 0x257   : > { %v1487_v12 = vpop.f32.mrf.mxu0 }
 0x258   : > { %v1488_v13 = vadd.f32 %v2312_v62, %v1487_v12  ;;  %v1501_v2 = vpop.f32.mrf.mxu1 }
 0x25a   : > { %v1502_v16 = vadd.f32 %v1501_v2, %v1488_v13 }
 0x25c   : > { %v1505_v17 = vmax.f32 %v1502_v16, 0.0 }
 0x25e   : > { %v1507_v21 = vmin.f32 %v1505_v17, 6.0 }
 0x260   : > { %v1508_v4 = vpack.c.bf16 %v1507_v21, %v1506_v20 }
 0x262   : > { %1619 = vmatmul.bf16.vlgmr.msra.gmra.mxu2 %v1508_v4  ;;  %1633 = vmatmul.bf16.vlgmr.msra.gmra.mxu3 %v1508_v4 }
 0x2e5   : > { %v1620_v30 = vpop.f32.mrf.mxu2  ;;  %v1634_v33 = vpop.f32.mrf.mxu3 }
 0x2e6   : > { %v1621_v37 = vadd.f32 %v1620_v30, %v1527_v25  ;;  %v1635_v39 = vadd.f32 %v1634_v33, %v1528_v26 }
 0x2e8   : > { %1639 = vst [vmem:[%s2953_s19] sm:$0xff] %v1621_v37 }
 0x2e9   : > { %1640 = vst [vmem:[%s2953_s19 + $0x8] sm:$0xff] %v1635_v39 }
 0x2ed   : > { %v1622_v42 = vpop.f32.mrf.mxu2  ;;  %v1636_v43 = vpop.f32.mrf.mxu3 }
 0x2ee   : > { %v1623_v44 = vadd.f32 %v1622_v42, %v1527_v25  ;;  %v1637_v45 = vadd.f32 %v1636_v43, %v1528_v26 }
 0x2f0   : > { %1641 = vst [vmem:[%s2953_s19 + $0x10] sm:$0xff] %v1623_v44 }
 0x2f1   : > { %1642 = vst [vmem:[%s2953_s19 + $0x18] sm:$0xff] %v1637_v45 }
 0x2f2 PF: > { %s3167_s20 = sld [smem:[#allocation22_spill]]  ;;  %s1657_s8 = sshll.u32 %s2953_s19, 4  ;;  %s1658_s8 = int_to_ptr.vmem [resolvable:$true] %s1657_s8 }
 0x2f3   : > { %s3169_s3 = sld [smem:[#allocation33_spill]]  ;;  %s1644_s23 = scalar_lea.sflag [#allocation5], %s402_s18 }
 0x2f8   : > { %s2138_s13 = sshll.u32 %s3167_s20, 5 }
 0x2f9   : > { %s1656_s26 = scalar_lea.hbm %s3169_s3, %s2138_s13  ;;  %s2453_s30 = scalar_lea.hbm %s3169_s3, 64 }
 0x2fa   : > { %s1659_s14 = sshll.u32 %s1656_s26, 4  ;;  %s1660_s14 = int_to_ptr.hbm [resolvable:$true] %s1659_s14 }
 0x2fb   : > { %s2447_s17 = sshra.s32 %s1660_s14, 4  ;;  %s2448_s17 = int_to_ptr.hbm [resolvable:$true] %s2447_s17 }
 0x2fc   : > { %s2449_s22 = scalar_lea.hbm %s2448_s17, 32  ;;  %p2454_p1 = scmp.lt.s32.totalorder %s2448_s17, %s3169_s3 }
 0x2fd   : > { %p2450_p11 = scmp.ne.s32.totalorder %s2448_s17, %s2449_s22  ;;  %p2455_p2 = scmp.lt.s32.totalorder %s2453_s30, %s2449_s22 }
 0x2ff   : > { %p2451_p13 = pnand %p2450_p11, %p2709_p12  ;;  %p2456_p5 = por %p2455_p2, %p2454_p1 }
 0x301   : > { %p2452_p0 = pneg %p2451_p13 }
 0x303   : > { %p2457_p8 = pnand %p2456_p5, %p2452_p0 }
 0x305   : > { %2460 = shalt.err (!%p2457_p8)
}
 0x306   : > { %s2579_s18 = smov 256   ;;  %s2580_s19 = smov 16  }
 0x307   : > { %2180 = dma.vmem_to_hbm [thread:$0]  (%p2709_p12), %s1658_s8, 512, %s1660_s14, %s1644_s23, %s2579_s18, %s2579_s18, %s2580_s19  }
 0x308 PF: > { %s3170_s27 = sld [smem:[#allocation20_spill]]  ;;  %p2207_p9 = scmp.ge.s32.totalorder %s2563_s11, 2 }
 0x30a   : > { %p2196_p10 = pnand %p2207_p9, %p2723_p4 }
 0x30c   : > { %p2197_p3 = pneg %p2196_p10 }
 0x30e   : > { %s1674_s15 = sand.u32 1, %s3170_s27  }
 0x30f   : > { %s1675_s20 = scalar_lea.sflag [#allocation5], %s1674_s15 }
 0x310   : > { %2518 = dma.done.wait (%p2197_p3), %s1675_s20, 512  }
 0x311   : > { %2520 = vsyncadd (%p2197_p3), %s1675_s20, 4294966784  ;;  %s25_s11 = sadd.s32 1, %s2563_s11   ;;  %s3172_s13 = sld [smem:[#allocation21_spill]] }
 0x312   : > { %p22_p6 = scmp.ge.s32.totalorder %s25_s11, 6   ;;  %s3173_s26 = sld [smem:[#allocation26_spill]] }
 0x313   : > { %s3174_s1 = sld [smem:[#allocation27_spill]]  ;;  %s3177_s24 = smov %s2527_s25 }
 0x314   : > { %s3175_s4 = sld [smem:[#allocation23_spill]]  ;;  %s3179_s27 = smov %s2539_s28 }
 0x315   : > { %s3176_s6 = sld [smem:[#allocation24_spill]]  ;;  %s3180_s28 = smov %s2543_s29 }
 0x316   : > { %s3182_s30 = smov %s2555_s9  ;;  %s3183_s8 = smov %s2559_s10 }
 0x317   : > { %s3178_s25 = smov %s3172_s13  ;;  %24 = sbr.rel (!%p22_p6) target bundleno = 17 (0x11), region = 126 }
 0x319   : > { %s3181_s29 = smov %s3174_s1 }
 0x31a   : > { %s3184_s9 = smov %s3175_s4 }
 0x31b   : > { %s3185_s10 = smov %s3176_s6 }
 0x31c   :  { %1681 = vsyncpa [#allocation4], 1 }
 0x31d   :  { %1683 = vsyncpa [#allocation4 + $0x1], 1 }
 0x31e   :  { %1684 = vsyncpa [#allocation7], 1 }
 0x31f   :  { %1685 = vsyncpa [#allocation10], 1 }
 0x320   :  { %1686 = vsyncpa [#allocation5], 1 }
 0x321   :  { %1688 = vsyncpa [#allocation5 + $0x1], 1 }

</bundles_post_ra>
